<compile_context>
chip_gen: v6e
topology: v6e:2x2x1
jax: 0.10.0
libtpu: 0.0.40
codegen_flags: <defaults>
</compile_context>

<pallas_src>
import functools
import math

import jax
import jax.numpy as jnp
from jax.experimental import pallas as pl
from jax.experimental.pallas import tpu as pltpu

LN_EPS = 1e-5
INIT_RANGE = 0.02


def _vmem_limit_bytes():
    # Generation-aware VMEM budget (v7x: 64 MiB physical, v5e/v6e: 128 MiB).
    try:
        info = pltpu.get_tpu_info()
        cap = getattr(info, "vmem_capacity_bytes", None)
        if cap:
            return int(cap) * 3 // 4
    except Exception:
        pass
    return 48 * 1024 * 1024


# ------------------------- in-kernel helpers -------------------------

def _layernorm(x, w, b, eps):
    # Matches the PyTorch module exactly: eps is added to sqrt(var), not inside.
    mean = jnp.mean(x, axis=-1, keepdims=True)
    var = jnp.mean((x - mean) ** 2, axis=-1, keepdims=True)
    return (x - mean) / (jnp.sqrt(var) + eps) * w + b


def _gelu_new(x):
    # GPT-2 "new" gelu (transformer_lens gelu_new).
    return 0.5 * x * (1.0 + jnp.tanh(jnp.sqrt(2.0 / jnp.pi) * (x + 0.044715 * x ** 3)))


# ------------------------- tiling helpers -------------------------

def _pick_batch_tile(B):
    # Keep the parallel batch axis at extent >= 2 when possible (feeds both v7x TCs)
    # while still folding sequences together to cut per-layer weight re-streaming
    # (weights are streamed at most twice instead of B times).
    if B >= 4 and B % 2 == 0:
        return B // 2
    return 1 if B >= 2 else B


def _pick_vocab_tile(Vp):
    for c in (1024, 512, 256, 128):
        if Vp % c == 0:
            return c
    return Vp


def _pick_row_tile(n):
    for c in (512, 256, 128, 64, 32, 16, 8):
        if n % c == 0 and n // c >= 2:
            return c
    return n


# ------------------------- fused transformer-block stack kernel -------------------------

def run_blocks(embeds, causal_bias, packed, cfg):
    """Runs all transformer blocks in a single pallas_call.

    grid = (B // Bt, n_layers); residual is a VMEM-resident accumulator over the
    layer axis; Bt sequences are processed per grid step.
    """
    B, S, D = embeds.shape
    H, DH = cfg["n_heads"], cfg["d_head"]
    HDH = H * DH
    L = packed["w_qkv"].shape[0]
    DM = packed["w_in"].shape[-1]
    scale = 1.0 / math.sqrt(DH)

    BT = _pick_batch_tile(B)
    assert B % BT == 0
    BTS = BT * S

    def kernel(x_ref, mask_ref, ln1w_ref, ln1b_ref, wqkv_ref, bqkv_ref, wo_ref, bo_ref,
               ln2w_ref, ln2b_ref, win_ref, bin_ref, wout_ref, bout_ref, out_ref):
        layer = pl.program_id(1)

        # Initialize the resident residual accumulator from the embeddings at layer 0.
        @pl.when(layer == 0)
        def _():
            out_ref[...] = x_ref[...]

        x = out_ref[...].reshape(BTS, D)                                 # f32 residual

        # ---------------- attention ----------------
        xn = _layernorm(x, ln1w_ref[...], ln1b_ref[...], LN_EPS)        # (BTS, D) f32
        # One fused lane-dense projection for Q, K and V of all heads (bf16 x bf16 -> f32).
        qkv = jnp.dot(xn.astype(jnp.bfloat16), wqkv_ref[...],
                      preferred_element_type=jnp.float32) + bqkv_ref[...]   # (BTS, 3*HDH)

        def split_heads(t2d):
            # (BTS, HDH) f32 -> (BT*H, S, DH) bf16 (head becomes the batch dim of the
            # batched matmuls; cast to bf16 only after the relayout).
            t = t2d.reshape(BT, S, H, DH)
            t = jnp.swapaxes(t, 1, 2)
            return t.reshape(BT * H, S, DH).astype(jnp.bfloat16)

        q = split_heads(qkv[:, :HDH])
        k = split_heads(qkv[:, HDH:2 * HDH])
        v = split_heads(qkv[:, 2 * HDH:])

        # Batched Q.K^T over all (sequence, head) pairs; contraction on the last dim of
        # both operands -> no explicit k transpose is materialized.
        scores = jnp.einsum("zqd,zkd->zqk", q, k,
                            preferred_element_type=jnp.float32) * scale      # (BT*H, S, S)
        scores = scores + mask_ref[...]                                       # additive causal bias
        scores = scores - jnp.max(scores, axis=-1, keepdims=True)
        e = jnp.exp(scores)
        probs = e * pl.reciprocal(jnp.sum(e, axis=-1, keepdims=True), approx=True)

        ctx = jnp.einsum("zqk,zkd->zqd", probs.astype(jnp.bfloat16), v,
                         preferred_element_type=jnp.float32)                  # (BT*H, S, DH)
        agg = jnp.swapaxes(ctx.reshape(BT, H, S, DH), 1, 2).reshape(BTS, HDH)

        # Fused output projection across all heads (b_O added exactly once).
        attn_out = jnp.dot(agg.astype(jnp.bfloat16), wo_ref[...],
                           preferred_element_type=jnp.float32) + bo_ref[...]
        resid_mid = x + attn_out

        # ---------------- MLP ----------------
        xm = _layernorm(resid_mid, ln2w_ref[...], ln2b_ref[...], LN_EPS)
        h1 = _gelu_new(jnp.dot(xm.astype(jnp.bfloat16), win_ref[...],
                               preferred_element_type=jnp.float32) + bin_ref[...])
        mlp_out = jnp.dot(h1.astype(jnp.bfloat16), wout_ref[...],
                          preferred_element_type=jnp.float32) + bout_ref[...]

        out_ref[...] = (resid_mid + mlp_out).reshape(BT, S, D)

    def w_spec(shape):
        # Layer-indexed weight: array is (L, *shape); kernel sees `shape`.
        nd = len(shape)
        return pl.BlockSpec((None,) + shape, lambda b, l, _n=nd: (l,) + (0,) * _n)

    in_specs = [
        pl.BlockSpec((BT, S, D), lambda b, l: (b, 0, 0)),     # embeddings (per batch tile)
        pl.BlockSpec((S, S), lambda b, l: (0, 0)),            # causal bias (fetched once)
        w_spec((1, D)), w_spec((1, D)),                       # ln1 w / b
        w_spec((D, 3 * HDH)), w_spec((1, 3 * HDH)),           # fused W_QKV / b_QKV
        w_spec((HDH, D)), w_spec((1, D)),                     # fused W_O / b_O
        w_spec((1, D)), w_spec((1, D)),                       # ln2 w / b
        w_spec((D, DM)), w_spec((1, DM)),                     # W_in / b_in
        w_spec((DM, D)), w_spec((1, D)),                      # W_out / b_out
    ]
    out_spec = pl.BlockSpec((BT, S, D), lambda b, l: (b, 0, 0))

    return pl.pallas_call(
        kernel,
        grid=(B // BT, L),
        in_specs=in_specs,
        out_specs=out_spec,
        out_shape=jax.ShapeDtypeStruct((B, S, D), jnp.float32),
        input_output_aliases={0: 0},
        compiler_params=pltpu.CompilerParams(
            dimension_semantics=("parallel", "arbitrary"),
            vmem_limit_bytes=_vmem_limit_bytes(),
        ),
    )(embeds, causal_bias,
      packed["ln1_w"], packed["ln1_b"],
      packed["w_qkv"], packed["b_qkv"],
      packed["w_o"], packed["b_o"],
      packed["ln2_w"], packed["ln2_b"],
      packed["w_in"], packed["b_in"],
      packed["w_out"], packed["b_out"])


# ------------------------- final LayerNorm + unembed (row x vocab tiled) -------------------------

def run_unembed(resid, ln_w, ln_b, w_u_bf, d_vocab):
    B, S, D = resid.shape
    Vp = w_u_bf.shape[-1]                 # already padded to a multiple of 128, bf16
    TV = _pick_vocab_tile(Vp)
    BS = B * S
    TR = _pick_row_tile(BS)

    resid2d = resid.reshape(BS, D)

    def kernel(x_ref, w_ref, b_ref, wu_ref, out_ref, xn_ref):
        # LayerNorm is computed once per row tile (at the first vocab tile) and cached
        # in VMEM scratch; every vocab tile then only streams a W_U column block.
        @pl.when(pl.program_id(1) == 0)
        def _():
            xn_ref[...] = _layernorm(x_ref[...], w_ref[...], b_ref[...],
                                     LN_EPS).astype(jnp.bfloat16)
        out_ref[...] = jnp.dot(xn_ref[...], wu_ref[...],
                               preferred_element_type=jnp.float32)

    out2d = pl.pallas_call(
        kernel,
        grid=(BS // TR, Vp // TV),
        in_specs=[
            pl.BlockSpec((TR, D), lambda i, j: (i, 0)),
            pl.BlockSpec((1, D), lambda i, j: (0, 0)),
            pl.BlockSpec((1, D), lambda i, j: (0, 0)),
            pl.BlockSpec((D, TV), lambda i, j: (0, j)),    # column tile of W_U (double-buffered)
        ],
        out_specs=pl.BlockSpec((TR, TV), lambda i, j: (i, j)),
        out_shape=jax.ShapeDtypeStruct((BS, Vp), jnp.float32),
        scratch_shapes=[pltpu.VMEM((TR, D), jnp.bfloat16)],
        compiler_params=pltpu.CompilerParams(
            dimension_semantics=("parallel", "arbitrary"),
            vmem_limit_bytes=_vmem_limit_bytes(),
        ),
    )(resid2d, ln_w, ln_b, w_u_bf)
    return out2d[:, :d_vocab].reshape(B, S, d_vocab)


# ------------------------- weight packing (host-side, ONCE) -------------------------

def pack_params(params, cfg):
    D, DH, H = cfg["d_model"], cfg["d_head"], cfg["n_heads"]
    V = cfg["d_vocab"]
    blocks = params["blocks"]
    L = len(blocks)

    def stack(name):
        return jnp.stack([b[name] for b in blocks], axis=0)

    # (L, H, D, DH) -> (L, D, H*DH), head-major columns.
    wq = stack("W_Q").transpose(0, 2, 1, 3).reshape(L, D, H * DH)
    wk = stack("W_K").transpose(0, 2, 1, 3).reshape(L, D, H * DH)
    wv = stack("W_V").transpose(0, 2, 1, 3).reshape(L, D, H * DH)
    w_qkv = jnp.concatenate([wq, wk, wv], axis=-1).astype(jnp.bfloat16)   # (L, D, 3*H*DH)

    bq = stack("b_Q").reshape(L, 1, H * DH)
    bk = stack("b_K").reshape(L, 1, H * DH)
    bv = stack("b_V").reshape(L, 1, H * DH)
    b_qkv = jnp.concatenate([bq, bk, bv], axis=-1)                        # (L, 1, 3*H*DH) f32

    # W_U padded to a lane-dense vocab (multiple of 128) + bf16 cast, done once here.
    Vp = ((V + 127) // 128) * 128
    w_u = params["W_U"]
    if Vp != V:
        w_u = jnp.pad(w_u, ((0, 0), (0, Vp - V)))

    return {
        "ln1_w": stack("ln1_w").reshape(L, 1, D),
        "ln1_b": stack("ln1_b").reshape(L, 1, D),
        "w_qkv": w_qkv,
        "b_qkv": b_qkv,
        "w_o": stack("W_O").reshape(L, H * DH, D).astype(jnp.bfloat16),   # head-major rows
        "b_o": stack("b_O").reshape(L, 1, D),
        "ln2_w": stack("ln2_w").reshape(L, 1, D),
        "ln2_b": stack("ln2_b").reshape(L, 1, D),
        "w_in": stack("W_in").astype(jnp.bfloat16),                       # (L, D, d_mlp)
        "b_in": stack("b_in").reshape(L, 1, -1),
        "w_out": stack("W_out").astype(jnp.bfloat16),                     # (L, d_mlp, D)
        "b_out": stack("b_out").reshape(L, 1, D),
        "w_e": params["W_E"],
        "w_pos": params["W_pos"],
        "ln_f_w": params["ln_final_w"].reshape(1, D),
        "ln_f_b": params["ln_final_b"].reshape(1, D),
        "w_u": w_u.astype(jnp.bfloat16),                                  # (D, Vp) bf16
    }


# ------------------------- full forward -------------------------

def demo_transformer_forward(tokens, packed, cfg):
    B, S = tokens.shape
    # Embed + PosEmbed (gather glue in plain JAX).
    embeds = (jnp.take(packed["w_e"], tokens, axis=0)
              + packed["w_pos"][:S][None, :, :]).astype(jnp.float32)
    # Additive causal bias, built once per forward (fetched into VMEM once by the kernel).
    col = jnp.arange(S)[None, :]
    row = jnp.arange(S)[:, None]
    causal_bias = jnp.where(col > row, jnp.float32(-1e30), jnp.float32(0.0))

    resid = run_blocks(embeds, causal_bias, packed, cfg)
    return run_unembed(resid, packed["ln_f_w"], packed["ln_f_b"],
                       packed["w_u"], cfg["d_vocab"])


# ------------------------- pure-JAX reference (for verification) -------------------------

def reference_forward(tokens, params, cfg):
    B, S = tokens.shape
    x = jnp.take(params["W_E"], tokens, axis=0) + params["W_pos"][:S][None, :, :]

    def ln(v, w, b):
        m = jnp.mean(v, axis=-1, keepdims=True)
        var = jnp.mean((v - m) ** 2, axis=-1, keepdims=True)
        return (v - m) / (jnp.sqrt(var) + LN_EPS) * w + b

    row = jnp.arange(S)[:, None]
    col = jnp.arange(S)[None, :]
    causal = col > row

    for bp in params["blocks"]:
        xn = ln(x, bp["ln1_w"], bp["ln1_b"])
        q = jnp.einsum("bsd,hde->bhse", xn, bp["W_Q"]) + bp["b_Q"][None, :, None, :]
        k = jnp.einsum("bsd,hde->bhse", xn, bp["W_K"]) + bp["b_K"][None, :, None, :]
        v = jnp.einsum("bsd,hde->bhse", xn, bp["W_V"]) + bp["b_V"][None, :, None, :]
        scores = jnp.einsum("bhqe,bhke->bhqk", q, k) / math.sqrt(cfg["d_head"])
        scores = jnp.where(causal[None, None], -jnp.inf, scores)
        weights = jax.nn.softmax(scores, axis=-1)
        agg = jnp.einsum("bhqk,bhke->bhqe", weights, v)
        upd = jnp.einsum("bhqe,hed->bqd", agg, bp["W_O"]) + bp["b_O"]
        x = x + upd
        xm = ln(x, bp["ln2_w"], bp["ln2_b"])
        h1 = _gelu_new(xm @ bp["W_in"] + bp["b_in"])
        x = x + (h1 @ bp["W_out"] + bp["b_out"])

    xf = ln(x, params["ln_final_w"], params["ln_final_b"])
    return xf @ params["W_U"]


# ------------------------- parameter init -------------------------

def init_params(key, cfg):
    D, DH, H = cfg["d_model"], cfg["d_head"], cfg["n_heads"]
    DM, V, CTX = cfg["d_mlp"], cfg["d_vocab"], cfg["n_ctx"]

    def nrm(k, shape):
        return (INIT_RANGE * jax.random.normal(k, shape)).astype(jnp.float32)

    keys = jax.random.split(key, 3 + 6 * cfg["n_layers"])
    ki = iter(keys)

    params = {
        "W_E": nrm(next(ki), (V, D)),
        "W_pos": nrm(next(ki), (CTX, D)),
        "ln_final_w": jnp.ones((D,), jnp.float32),
        "ln_final_b": jnp.zeros((D,), jnp.float32),
        "W_U": nrm(next(ki), (D, V)),
        "b_U": jnp.zeros((V,), jnp.float32),  # defined in module but unused in forward
        "blocks": [],
    }
    for _ in range(cfg["n_layers"]):
        params["blocks"].append({
            "ln1_w": jnp.ones((D,), jnp.float32),
            "ln1_b": jnp.zeros((D,), jnp.float32),
            "W_Q": nrm(next(ki), (H, D, DH)),
            "W_K": nrm(next(ki), (H, D, DH)),
            "W_V": nrm(next(ki), (H, D, DH)),
            "W_O": nrm(next(ki), (H, DH, D)),
            "b_Q": jnp.zeros((H, DH), jnp.float32),
            "b_K": jnp.zeros((H, DH), jnp.float32),
            "b_V": jnp.zeros((H, DH), jnp.float32),
            "b_O": jnp.zeros((D,), jnp.float32),
            "ln2_w": jnp.ones((D,), jnp.float32),
            "ln2_b": jnp.zeros((D,), jnp.float32),
            "W_in": nrm(next(ki), (D, DM)),
            "b_in": jnp.zeros((DM,), jnp.float32),
            "W_out": nrm(next(ki), (DM, D)),
            "b_out": jnp.zeros((D,), jnp.float32),
        })
    return params


# ------------------------- main -------------------------

if __name__ == "__main__":
    # Small, self-consistent config (same structure as the GPT-2 Config, scaled down).
    cfg = dict(d_model=64, d_head=16, n_heads=4, d_mlp=128,
               d_vocab=128, n_ctx=16, n_layers=2)

    key = jax.random.PRNGKey(0)
    pkey, tkey = jax.random.split(key)
    params = init_params(pkey, cfg)

    batch, seq = 2, 8
    tokens = jax.random.randint(tkey, (batch, seq), 0, cfg["d_vocab"], dtype=jnp.int32)

    # Pack / cast weights ONCE (hoisted out of the forward pass).
    packed = pack_params(params, cfg)
    forward = jax.jit(functools.partial(demo_transformer_forward, cfg=cfg))

    logits = forward(tokens, packed)
    logits = jax.block_until_ready(logits)

    assert logits.shape == (batch, seq, cfg["d_vocab"])
    assert logits.dtype == jnp.float32

    ref = reference_forward(tokens, params, cfg)
    max_err = float(jnp.max(jnp.abs(logits - ref)))
    assert max_err < 3e-2, f"kernel/reference mismatch, max abs err = {max_err}"

    print("KERNEL_OK")
</pallas_src>

<mosaic_0001>
module attributes {stable_mosaic.version = 11 : i64} {
  func.func @kernel(%arg0: i32, %arg1: i32, %arg2: memref<1x8x64xf32, #tpu.memory_space<vmem>>, %arg3: memref<8x8xf32, #tpu.memory_space<vmem>>, %arg4: memref<1x1x64xf32, #tpu.memory_space<vmem>>, %arg5: memref<1x1x64xf32, #tpu.memory_space<vmem>>, %arg6: memref<1x64x192xbf16, #tpu.memory_space<vmem>>, %arg7: memref<1x1x192xf32, #tpu.memory_space<vmem>>, %arg8: memref<1x64x64xbf16, #tpu.memory_space<vmem>>, %arg9: memref<1x1x64xf32, #tpu.memory_space<vmem>>, %arg10: memref<1x1x64xf32, #tpu.memory_space<vmem>>, %arg11: memref<1x1x64xf32, #tpu.memory_space<vmem>>, %arg12: memref<1x64x128xbf16, #tpu.memory_space<vmem>>, %arg13: memref<1x1x128xf32, #tpu.memory_space<vmem>>, %arg14: memref<1x128x64xbf16, #tpu.memory_space<vmem>>, %arg15: memref<1x1x64xf32, #tpu.memory_space<vmem>>, %arg16: memref<1x8x64xf32, #tpu.memory_space<vmem>>) attributes {dimension_semantics = [#tpu.dimension_semantics<parallel>, #tpu.dimension_semantics<arbitrary>], iteration_bounds = array<i64: 2, 2>, scalar_prefetch = 0 : i64, scratch_operands = 0 : i64, tpu.core_type = #tpu.core_type<tc>, window_params = [{transform_indices = @transform_0, window_bounds = array<i64: 1, 8, 64>}, {pipeline_mode = #tpu.pipeline_mode<synchronous>, transform_indices = @transform_1, window_bounds = array<i64: 8, 8>}, {transform_indices = @transform_2, window_bounds = array<i64: 1, 1, 64>}, {transform_indices = @transform_3, window_bounds = array<i64: 1, 1, 64>}, {transform_indices = @transform_4, window_bounds = array<i64: 1, 64, 192>}, {transform_indices = @transform_5, window_bounds = array<i64: 1, 1, 192>}, {transform_indices = @transform_6, window_bounds = array<i64: 1, 64, 64>}, {transform_indices = @transform_7, window_bounds = array<i64: 1, 1, 64>}, {transform_indices = @transform_8, window_bounds = array<i64: 1, 1, 64>}, {transform_indices = @transform_9, window_bounds = array<i64: 1, 1, 64>}, {transform_indices = @transform_10, window_bounds = array<i64: 1, 64, 128>}, {transform_indices = @transform_11, window_bounds = array<i64: 1, 1, 128>}, {transform_indices = @transform_12, window_bounds = array<i64: 1, 128, 64>}, {transform_indices = @transform_13, window_bounds = array<i64: 1, 1, 64>}, {transform_indices = @transform_14, window_bounds = array<i64: 1, 8, 64>}]} {
    %c0_i32 = arith.constant 0 : i32
    %0 = arith.cmpi eq, %arg1, %c0_i32 : i32
    %1 = arith.extui %0 : i1 to i32
    %c0_i32_0 = arith.constant 0 : i32
    %2 = arith.cmpi ne, %1, %c0_i32_0 : i32
    scf.if %2 {
      %c0_66 = arith.constant 0 : index
      %c0_67 = arith.constant 0 : index
      %c0_68 = arith.constant 0 : index
      %144 = vector.load %arg2[%c0_66, %c0_67, %c0_68] : memref<1x8x64xf32, #tpu.memory_space<vmem>>, vector<1x8x64xf32>
      %c0_69 = arith.constant 0 : index
      %c0_70 = arith.constant 0 : index
      %c0_71 = arith.constant 0 : index
      %145 = vector.load %arg16[%c0_69, %c0_70, %c0_71] : memref<1x8x64xf32, #tpu.memory_space<vmem>>, vector<1x8x64xf32>
      tpu.vector_store %arg16[%c0_69, %c0_70, %c0_71], %144 {strides = array<i32>} : memref<1x8x64xf32, #tpu.memory_space<vmem>>, vector<1x8x64xf32>,
    } else {
    }
    %c0 = arith.constant 0 : index
    %c0_1 = arith.constant 0 : index
    %c0_2 = arith.constant 0 : index
    %3 = vector.load %arg16[%c0, %c0_1, %c0_2] : memref<1x8x64xf32, #tpu.memory_space<vmem>>, vector<1x8x64xf32>
    %4 = vector.shape_cast %3 : vector<1x8x64xf32> to vector<8x64xf32>
    %c0_3 = arith.constant 0 : index
    %c0_4 = arith.constant 0 : index
    %c0_5 = arith.constant 0 : index
    %5 = vector.load %arg4[%c0_3, %c0_4, %c0_5] : memref<1x1x64xf32, #tpu.memory_space<vmem>>, vector<1x1x64xf32>
    %6 = vector.shape_cast %5 : vector<1x1x64xf32> to vector<1x64xf32>
    %c0_6 = arith.constant 0 : index
    %c0_7 = arith.constant 0 : index
    %c0_8 = arith.constant 0 : index
    %7 = vector.load %arg5[%c0_6, %c0_7, %c0_8] : memref<1x1x64xf32, #tpu.memory_space<vmem>>, vector<1x1x64xf32>
    %8 = vector.shape_cast %7 : vector<1x1x64xf32> to vector<1x64xf32>
    %cst = arith.constant dense<0.000000e+00> : vector<8xf32>
    %9 = vector.multi_reduction <add>, %4, %cst [1] : vector<8x64xf32> to vector<8xf32>
    %10 = vector.shape_cast %9 : vector<8xf32> to vector<8x1xf32>
    %cst_9 = arith.constant 6.400000e+01 : f32
    %11 = vector.broadcast %cst_9 : f32 to vector<8x1xf32>
    %12 = arith.divf %10, %11 : vector<8x1xf32>
    %13 = vector.broadcast %12 : vector<8x1xf32> to vector<8x64xf32>
    %14 = arith.subf %4, %13 : vector<8x64xf32>
    %15 = arith.mulf %14, %14 : vector<8x64xf32>
    %cst_10 = arith.constant dense<0.000000e+00> : vector<8xf32>
    %16 = vector.multi_reduction <add>, %15, %cst_10 [1] : vector<8x64xf32> to vector<8xf32>
    %17 = vector.shape_cast %16 : vector<8xf32> to vector<8x1xf32>
    %cst_11 = arith.constant 6.400000e+01 : f32
    %18 = vector.broadcast %cst_11 : f32 to vector<8x1xf32>
    %19 = arith.divf %17, %18 : vector<8x1xf32>
    %20 = vector.broadcast %12 : vector<8x1xf32> to vector<8x64xf32>
    %21 = arith.subf %4, %20 : vector<8x64xf32>
    %22 = math.sqrt %19 : vector<8x1xf32>
    %cst_12 = arith.constant 9.99999974E-6 : f32
    %23 = vector.broadcast %cst_12 : f32 to vector<8x1xf32>
    %24 = arith.addf %22, %23 : vector<8x1xf32>
    %25 = vector.broadcast %24 : vector<8x1xf32> to vector<8x64xf32>
    %26 = arith.divf %21, %25 : vector<8x64xf32>
    %27 = vector.broadcast %6 : vector<1x64xf32> to vector<8x64xf32>
    %28 = arith.mulf %26, %27 : vector<8x64xf32>
    %29 = vector.broadcast %8 : vector<1x64xf32> to vector<8x64xf32>
    %30 = arith.addf %28, %29 : vector<8x64xf32>
    %31 = arith.truncf %30 : vector<8x64xf32> to vector<8x64xbf16>
    %c0_13 = arith.constant 0 : index
    %c0_14 = arith.constant 0 : index
    %c0_15 = arith.constant 0 : index
    %32 = vector.load %arg6[%c0_13, %c0_14, %c0_15] : memref<1x64x192xbf16, #tpu.memory_space<vmem>>, vector<1x64x192xbf16>
    %33 = vector.shape_cast %32 : vector<1x64x192xbf16> to vector<64x192xbf16>
    %cst_16 = arith.constant dense<0.000000e+00> : vector<8x192xf32>
    %34 = tpu.matmul %31, %33, %cst_16 {dimension_numbers = #tpu.dot_dimension_numbers<[1], [0], [0], [1], [0, 0, 1, 1], [], []>} : vector<8x64xbf16>, vector<64x192xbf16>, vector<8x192xf32> -> vector<8x192xf32>
    %c0_17 = arith.constant 0 : index
    %c0_18 = arith.constant 0 : index
    %c0_19 = arith.constant 0 : index
    %35 = vector.load %arg7[%c0_17, %c0_18, %c0_19] : memref<1x1x192xf32, #tpu.memory_space<vmem>>, vector<1x1x192xf32>
    %36 = vector.shape_cast %35 : vector<1x1x192xf32> to vector<1x192xf32>
    %37 = vector.broadcast %36 : vector<1x192xf32> to vector<8x192xf32>
    %38 = arith.addf %34, %37 : vector<8x192xf32>
    %39 = vector.extract_strided_slice %38 {offsets = [0, 0], sizes = [8, 64], strides = [1, 1]} : vector<8x192xf32> to vector<8x64xf32>
    %40 = vector.shape_cast %39 : vector<8x64xf32> to vector<1x8x4x16xf32>
    %41 = tpu.transpose %40, [0, 2, 1, 3] : vector<1x8x4x16xf32> -> vector<1x4x8x16xf32>
    %42 = vector.shape_cast %41 : vector<1x4x8x16xf32> to vector<4x8x16xf32>
    %43 = arith.truncf %42 : vector<4x8x16xf32> to vector<4x8x16xbf16>
    %44 = vector.extract_strided_slice %38 {offsets = [0, 64], sizes = [8, 64], strides = [1, 1]} : vector<8x192xf32> to vector<8x64xf32>
    %45 = vector.shape_cast %44 : vector<8x64xf32> to vector<1x8x4x16xf32>
    %46 = tpu.transpose %45, [0, 2, 1, 3] : vector<1x8x4x16xf32> -> vector<1x4x8x16xf32>
    %47 = vector.shape_cast %46 : vector<1x4x8x16xf32> to vector<4x8x16xf32>
    %48 = arith.truncf %47 : vector<4x8x16xf32> to vector<4x8x16xbf16>
    %49 = vector.extract_strided_slice %38 {offsets = [0, 128], sizes = [8, 64], strides = [1, 1]} : vector<8x192xf32> to vector<8x64xf32>
    %50 = vector.shape_cast %49 : vector<8x64xf32> to vector<1x8x4x16xf32>
    %51 = tpu.transpose %50, [0, 2, 1, 3] : vector<1x8x4x16xf32> -> vector<1x4x8x16xf32>
    %52 = vector.shape_cast %51 : vector<1x4x8x16xf32> to vector<4x8x16xf32>
    %53 = arith.truncf %52 : vector<4x8x16xf32> to vector<4x8x16xbf16>
    "tpu.trace_start"() <{level = 10 : i32, message = "zqd,zkd->zqk"}> : () -> ()
    %cst_20 = arith.constant dense<0.000000e+00> : vector<4x8x8xf32>
    %54 = tpu.matmul %43, %48, %cst_20 {dimension_numbers = #tpu.dot_dimension_numbers<[2], [2], [1], [1], [0, 0, 0, 1, 1, 1], [0], [0]>} : vector<4x8x16xbf16>, vector<4x8x16xbf16>, vector<4x8x8xf32> -> vector<4x8x8xf32>
    "tpu.trace_stop"() : () -> ()
    %cst_21 = arith.constant 2.500000e-01 : f32
    %55 = vector.broadcast %cst_21 : f32 to vector<4x8x8xf32>
    %56 = arith.mulf %54, %55 : vector<4x8x8xf32>
    %c0_22 = arith.constant 0 : index
    %c0_23 = arith.constant 0 : index
    %57 = vector.load %arg3[%c0_22, %c0_23] : memref<8x8xf32, #tpu.memory_space<vmem>>, vector<8x8xf32>
    %58 = vector.shape_cast %57 : vector<8x8xf32> to vector<1x8x8xf32>
    %59 = vector.broadcast %58 : vector<1x8x8xf32> to vector<4x8x8xf32>
    %60 = arith.addf %56, %59 : vector<4x8x8xf32>
    %cst_24 = arith.constant dense<0xFF800000> : vector<4x8xf32>
    %61 = vector.multi_reduction <maximumf>, %60, %cst_24 [2] : vector<4x8x8xf32> to vector<4x8xf32>
    %62 = vector.shape_cast %61 : vector<4x8xf32> to vector<4x8x1xf32>
    %63 = vector.broadcast %62 : vector<4x8x1xf32> to vector<4x8x8xf32>
    %64 = arith.subf %60, %63 : vector<4x8x8xf32>
    %65 = math.exp %64 : vector<4x8x8xf32>
    %cst_25 = arith.constant dense<0.000000e+00> : vector<4x8xf32>
    %66 = vector.multi_reduction <add>, %65, %cst_25 [2] : vector<4x8x8xf32> to vector<4x8xf32>
    %67 = vector.shape_cast %66 : vector<4x8xf32> to vector<4x8x1xf32>
    %68 = tpu.reciprocal %67 {approx = true} : vector<4x8x1xf32> -> vector<4x8x1xf32>
    %69 = vector.broadcast %68 : vector<4x8x1xf32> to vector<4x8x8xf32>
    %70 = arith.mulf %65, %69 : vector<4x8x8xf32>
    %71 = arith.truncf %70 : vector<4x8x8xf32> to vector<4x8x8xbf16>
    "tpu.trace_start"() <{level = 10 : i32, message = "zqk,zkd->zqd"}> : () -> ()
    %cst_26 = arith.constant dense<0.000000e+00> : vector<4x8x16xf32>
    %72 = tpu.matmul %71, %53, %cst_26 {dimension_numbers = #tpu.dot_dimension_numbers<[2], [1], [1], [2], [0, 0, 0, 1, 1, 2], [0], [0]>} : vector<4x8x8xbf16>, vector<4x8x16xbf16>, vector<4x8x16xf32> -> vector<4x8x16xf32>
    "tpu.trace_stop"() : () -> ()
    %73 = vector.shape_cast %72 : vector<4x8x16xf32> to vector<1x4x8x16xf32>
    %74 = tpu.transpose %73, [0, 2, 1, 3] : vector<1x4x8x16xf32> -> vector<1x8x4x16xf32>
    %75 = vector.shape_cast %74 : vector<1x8x4x16xf32> to vector<8x64xf32>
    %76 = arith.truncf %75 : vector<8x64xf32> to vector<8x64xbf16>
    %c0_27 = arith.constant 0 : index
    %c0_28 = arith.constant 0 : index
    %c0_29 = arith.constant 0 : index
    %77 = vector.load %arg8[%c0_27, %c0_28, %c0_29] : memref<1x64x64xbf16, #tpu.memory_space<vmem>>, vector<1x64x64xbf16>
    %78 = vector.shape_cast %77 : vector<1x64x64xbf16> to vector<64x64xbf16>
    %cst_30 = arith.constant dense<0.000000e+00> : vector<8x64xf32>
    %79 = tpu.matmul %76, %78, %cst_30 {dimension_numbers = #tpu.dot_dimension_numbers<[1], [0], [0], [1], [0, 0, 1, 1], [], []>} : vector<8x64xbf16>, vector<64x64xbf16>, vector<8x64xf32> -> vector<8x64xf32>
    %c0_31 = arith.constant 0 : index
    %c0_32 = arith.constant 0 : index
    %c0_33 = arith.constant 0 : index
    %80 = vector.load %arg9[%c0_31, %c0_32, %c0_33] : memref<1x1x64xf32, #tpu.memory_space<vmem>>, vector<1x1x64xf32>
    %81 = vector.shape_cast %80 : vector<1x1x64xf32> to vector<1x64xf32>
    %82 = vector.broadcast %81 : vector<1x64xf32> to vector<8x64xf32>
    %83 = arith.addf %79, %82 : vector<8x64xf32>
    %84 = arith.addf %4, %83 : vector<8x64xf32>
    %c0_34 = arith.constant 0 : index
    %c0_35 = arith.constant 0 : index
    %c0_36 = arith.constant 0 : index
    %85 = vector.load %arg10[%c0_34, %c0_35, %c0_36] : memref<1x1x64xf32, #tpu.memory_space<vmem>>, vector<1x1x64xf32>
    %86 = vector.shape_cast %85 : vector<1x1x64xf32> to vector<1x64xf32>
    %c0_37 = arith.constant 0 : index
    %c0_38 = arith.constant 0 : index
    %c0_39 = arith.constant 0 : index
    %87 = vector.load %arg11[%c0_37, %c0_38, %c0_39] : memref<1x1x64xf32, #tpu.memory_space<vmem>>, vector<1x1x64xf32>
    %88 = vector.shape_cast %87 : vector<1x1x64xf32> to vector<1x64xf32>
    %cst_40 = arith.constant dense<0.000000e+00> : vector<8xf32>
    %89 = vector.multi_reduction <add>, %84, %cst_40 [1] : vector<8x64xf32> to vector<8xf32>
    %90 = vector.shape_cast %89 : vector<8xf32> to vector<8x1xf32>
    %cst_41 = arith.constant 6.400000e+01 : f32
    %91 = vector.broadcast %cst_41 : f32 to vector<8x1xf32>
    %92 = arith.divf %90, %91 : vector<8x1xf32>
    %93 = vector.broadcast %92 : vector<8x1xf32> to vector<8x64xf32>
    %94 = arith.subf %84, %93 : vector<8x64xf32>
    %95 = arith.mulf %94, %94 : vector<8x64xf32>
    %cst_42 = arith.constant dense<0.000000e+00> : vector<8xf32>
    %96 = vector.multi_reduction <add>, %95, %cst_42 [1] : vector<8x64xf32> to vector<8xf32>
    %97 = vector.shape_cast %96 : vector<8xf32> to vector<8x1xf32>
    %cst_43 = arith.constant 6.400000e+01 : f32
    %98 = vector.broadcast %cst_43 : f32 to vector<8x1xf32>
    %99 = arith.divf %97, %98 : vector<8x1xf32>
    %100 = vector.broadcast %92 : vector<8x1xf32> to vector<8x64xf32>
    %101 = arith.subf %84, %100 : vector<8x64xf32>
    %102 = math.sqrt %99 : vector<8x1xf32>
    %cst_44 = arith.constant 9.99999974E-6 : f32
    %103 = vector.broadcast %cst_44 : f32 to vector<8x1xf32>
    %104 = arith.addf %102, %103 : vector<8x1xf32>
    %105 = vector.broadcast %104 : vector<8x1xf32> to vector<8x64xf32>
    %106 = arith.divf %101, %105 : vector<8x64xf32>
    %107 = vector.broadcast %86 : vector<1x64xf32> to vector<8x64xf32>
    %108 = arith.mulf %106, %107 : vector<8x64xf32>
    %109 = vector.broadcast %88 : vector<1x64xf32> to vector<8x64xf32>
    %110 = arith.addf %108, %109 : vector<8x64xf32>
    %111 = arith.truncf %110 : vector<8x64xf32> to vector<8x64xbf16>
    %c0_45 = arith.constant 0 : index
    %c0_46 = arith.constant 0 : index
    %c0_47 = arith.constant 0 : index
    %112 = vector.load %arg12[%c0_45, %c0_46, %c0_47] : memref<1x64x128xbf16, #tpu.memory_space<vmem>>, vector<1x64x128xbf16>
    %113 = vector.shape_cast %112 : vector<1x64x128xbf16> to vector<64x128xbf16>
    %cst_48 = arith.constant dense<0.000000e+00> : vector<8x128xf32>
    %114 = tpu.matmul %111, %113, %cst_48 {dimension_numbers = #tpu.dot_dimension_numbers<[1], [0], [0], [1], [0, 0, 1, 1], [], []>} : vector<8x64xbf16>, vector<64x128xbf16>, vector<8x128xf32> -> vector<8x128xf32>
    %c0_49 = arith.constant 0 : index
    %c0_50 = arith.constant 0 : index
    %c0_51 = arith.constant 0 : index
    %115 = vector.load %arg13[%c0_49, %c0_50, %c0_51] : memref<1x1x128xf32, #tpu.memory_space<vmem>>, vector<1x1x128xf32>
    %116 = vector.shape_cast %115 : vector<1x1x128xf32> to vector<1x128xf32>
    %117 = vector.broadcast %116 : vector<1x128xf32> to vector<8x128xf32>
    %118 = arith.addf %114, %117 : vector<8x128xf32>
    %cst_52 = arith.constant 5.000000e-01 : f32
    %119 = vector.broadcast %cst_52 : f32 to vector<8x128xf32>
    %120 = arith.mulf %119, %118 : vector<8x128xf32>
    %cst_53 = arith.constant 0.636619746 : f32
    %121 = math.sqrt %cst_53 : f32
    %122 = arith.mulf %118, %118 : vector<8x128xf32>
    %123 = arith.mulf %118, %122 : vector<8x128xf32>
    %cst_54 = arith.constant 4.471500e-02 : f32
    %124 = vector.broadcast %cst_54 : f32 to vector<8x128xf32>
    %125 = arith.mulf %124, %123 : vector<8x128xf32>
    %126 = arith.addf %118, %125 : vector<8x128xf32>
    %127 = vector.broadcast %121 : f32 to vector<8x128xf32>
    %128 = arith.mulf %127, %126 : vector<8x128xf32>
    %129 = math.tanh %128 : vector<8x128xf32>
    %cst_55 = arith.constant 1.000000e+00 : f32
    %130 = vector.broadcast %cst_55 : f32 to vector<8x128xf32>
    %131 = arith.addf %130, %129 : vector<8x128xf32>
    %132 = arith.mulf %120, %131 : vector<8x128xf32>
    %133 = arith.truncf %132 : vector<8x128xf32> to vector<8x128xbf16>
    %c0_56 = arith.constant 0 : index
    %c0_57 = arith.constant 0 : index
    %c0_58 = arith.constant 0 : index
    %134 = vector.load %arg14[%c0_56, %c0_57, %c0_58] : memref<1x128x64xbf16, #tpu.memory_space<vmem>>, vector<1x128x64xbf16>
    %135 = vector.shape_cast %134 : vector<1x128x64xbf16> to vector<128x64xbf16>
    %cst_59 = arith.constant dense<0.000000e+00> : vector<8x64xf32>
    %136 = tpu.matmul %133, %135, %cst_59 {dimension_numbers = #tpu.dot_dimension_numbers<[1], [0], [0], [1], [0, 0, 1, 1], [], []>} : vector<8x128xbf16>, vector<128x64xbf16>, vector<8x64xf32> -> vector<8x64xf32>
    %c0_60 = arith.constant 0 : index
    %c0_61 = arith.constant 0 : index
    %c0_62 = arith.constant 0 : index
    %137 = vector.load %arg15[%c0_60, %c0_61, %c0_62] : memref<1x1x64xf32, #tpu.memory_space<vmem>>, vector<1x1x64xf32>
    %138 = vector.shape_cast %137 : vector<1x1x64xf32> to vector<1x64xf32>
    %139 = vector.broadcast %138 : vector<1x64xf32> to vector<8x64xf32>
    %140 = arith.addf %136, %139 : vector<8x64xf32>
    %141 = arith.addf %84, %140 : vector<8x64xf32>
    %142 = vector.shape_cast %141 : vector<8x64xf32> to vector<1x8x64xf32>
    %c0_63 = arith.constant 0 : index
    %c0_64 = arith.constant 0 : index
    %c0_65 = arith.constant 0 : index
    %143 = vector.load %arg16[%c0_63, %c0_64, %c0_65] : memref<1x8x64xf32, #tpu.memory_space<vmem>>, vector<1x8x64xf32>
    tpu.vector_store %arg16[%c0_63, %c0_64, %c0_65], %142 {strides = array<i32>} : memref<1x8x64xf32, #tpu.memory_space<vmem>>, vector<1x8x64xf32>,
    return
  }
  func.func @transform_0(%arg0: i32, %arg1: i32) -> (i32, i32, i32) {
    %c0_i32 = arith.constant 0 : i32
    %c0_i32_0 = arith.constant 0 : i32
    %c0_i32_1 = arith.constant 0 : i32
    return %arg0, %c0_i32, %c0_i32_0 : i32, i32, i32
  }
  func.func @transform_1(%arg0: i32, %arg1: i32) -> (i32, i32) {
    %c0_i32 = arith.constant 0 : i32
    %c0_i32_0 = arith.constant 0 : i32
    %c0_i32_1 = arith.constant 0 : i32
    return %c0_i32, %c0_i32_0 : i32, i32
  }
  func.func @transform_2(%arg0: i32, %arg1: i32) -> (i32, i32, i32) {
    %c0_i32 = arith.constant 0 : i32
    %c0_i32_0 = arith.constant 0 : i32
    %c0_i32_1 = arith.constant 0 : i32
    return %arg1, %c0_i32, %c0_i32_0 : i32, i32, i32
  }
  func.func @transform_3(%arg0: i32, %arg1: i32) -> (i32, i32, i32) {
    %c0_i32 = arith.constant 0 : i32
    %c0_i32_0 = arith.constant 0 : i32
    %c0_i32_1 = arith.constant 0 : i32
    return %arg1, %c0_i32, %c0_i32_0 : i32, i32, i32
  }
  func.func @transform_4(%arg0: i32, %arg1: i32) -> (i32, i32, i32) {
    %c0_i32 = arith.constant 0 : i32
    %c0_i32_0 = arith.constant 0 : i32
    %c0_i32_1 = arith.constant 0 : i32
    return %arg1, %c0_i32, %c0_i32_0 : i32, i32, i32
  }
  func.func @transform_5(%arg0: i32, %arg1: i32) -> (i32, i32, i32) {
    %c0_i32 = arith.constant 0 : i32
    %c0_i32_0 = arith.constant 0 : i32
    %c0_i32_1 = arith.constant 0 : i32
    return %arg1, %c0_i32, %c0_i32_0 : i32, i32, i32
  }
  func.func @transform_6(%arg0: i32, %arg1: i32) -> (i32, i32, i32) {
    %c0_i32 = arith.constant 0 : i32
    %c0_i32_0 = arith.constant 0 : i32
    %c0_i32_1 = arith.constant 0 : i32
    return %arg1, %c0_i32, %c0_i32_0 : i32, i32, i32
  }
  func.func @transform_7(%arg0: i32, %arg1: i32) -> (i32, i32, i32) {
    %c0_i32 = arith.constant 0 : i32
    %c0_i32_0 = arith.constant 0 : i32
    %c0_i32_1 = arith.constant 0 : i32
    return %arg1, %c0_i32, %c0_i32_0 : i32, i32, i32
  }
  func.func @transform_8(%arg0: i32, %arg1: i32) -> (i32, i32, i32) {
    %c0_i32 = arith.constant 0 : i32
    %c0_i32_0 = arith.constant 0 : i32
    %c0_i32_1 = arith.constant 0 : i32
    return %arg1, %c0_i32, %c0_i32_0 : i32, i32, i32
  }
  func.func @transform_9(%arg0: i32, %arg1: i32) -> (i32, i32, i32) {
    %c0_i32 = arith.constant 0 : i32
    %c0_i32_0 = arith.constant 0 : i32
    %c0_i32_1 = arith.constant 0 : i32
    return %arg1, %c0_i32, %c0_i32_0 : i32, i32, i32
  }
  func.func @transform_10(%arg0: i32, %arg1: i32) -> (i32, i32, i32) {
    %c0_i32 = arith.constant 0 : i32
    %c0_i32_0 = arith.constant 0 : i32
    %c0_i32_1 = arith.constant 0 : i32
    return %arg1, %c0_i32, %c0_i32_0 : i32, i32, i32
  }
  func.func @transform_11(%arg0: i32, %arg1: i32) -> (i32, i32, i32) {
    %c0_i32 = arith.constant 0 : i32
    %c0_i32_0 = arith.constant 0 : i32
    %c0_i32_1 = arith.constant 0 : i32
    return %arg1, %c0_i32, %c0_i32_0 : i32, i32, i32
  }
  func.func @transform_12(%arg0: i32, %arg1: i32) -> (i32, i32, i32) {
    %c0_i32 = arith.constant 0 : i32
    %c0_i32_0 = arith.constant 0 : i32
    %c0_i32_1 = arith.constant 0 : i32
    return %arg1, %c0_i32, %c0_i32_0 : i32, i32, i32
  }
  func.func @transform_13(%arg0: i32, %arg1: i32) -> (i32, i32, i32) {
    %c0_i32 = arith.constant 0 : i32
    %c0_i32_0 = arith.constant 0 : i32
    %c0_i32_1 = arith.constant 0 : i32
    return %arg1, %c0_i32, %c0_i32_0 : i32, i32, i32
  }
  func.func @transform_14(%arg0: i32, %arg1: i32) -> (i32, i32, i32) {
    %c0_i32 = arith.constant 0 : i32
    %c0_i32_0 = arith.constant 0 : i32
    %c0_i32_1 = arith.constant 0 : i32
    return %arg0, %c0_i32, %c0_i32_0 : i32, i32, i32
  }
}

module attributes {stable_mosaic.version = 11 : i64} {
  func.func @kernel(%arg0: i32, %arg1: i32, %arg2: memref<8x64xf32, #tpu.memory_space<vmem>>, %arg3: memref<1x64xf32, #tpu.memory_space<vmem>>, %arg4: memref<1x64xf32, #tpu.memory_space<vmem>>, %arg5: memref<64x128xbf16, #tpu.memory_space<vmem>>, %arg6: memref<8x128xf32, #tpu.memory_space<vmem>>, %arg7: memref<8x64xbf16, #tpu.memory_space<vmem>>) attributes {dimension_semantics = [#tpu.dimension_semantics<parallel>, #tpu.dimension_semantics<arbitrary>], iteration_bounds = array<i64: 2, 1>, scalar_prefetch = 0 : i64, scratch_operands = 1 : i64, tpu.core_type = #tpu.core_type<tc>, window_params = [{transform_indices = @transform_0, window_bounds = array<i64: 8, 64>}, {pipeline_mode = #tpu.pipeline_mode<synchronous>, transform_indices = @transform_1, window_bounds = array<i64: 1, 64>}, {pipeline_mode = #tpu.pipeline_mode<synchronous>, transform_indices = @transform_2, window_bounds = array<i64: 1, 64>}, {transform_indices = @transform_3, window_bounds = array<i64: 64, 128>}, {transform_indices = @transform_4, window_bounds = array<i64: 8, 128>}]} {
    %c0_i32 = arith.constant 0 : i32
    %0 = arith.cmpi eq, %arg1, %c0_i32 : i32
    %1 = arith.extui %0 : i1 to i32
    %c0_i32_0 = arith.constant 0 : i32
    %2 = arith.cmpi ne, %1, %c0_i32_0 : i32
    scf.if %2 {
      %c0_6 = arith.constant 0 : index
      %c0_7 = arith.constant 0 : index
      %7 = vector.load %arg2[%c0_6, %c0_7] : memref<8x64xf32, #tpu.memory_space<vmem>>, vector<8x64xf32>
      %c0_8 = arith.constant 0 : index
      %c0_9 = arith.constant 0 : index
      %8 = vector.load %arg3[%c0_8, %c0_9] : memref<1x64xf32, #tpu.memory_space<vmem>>, vector<1x64xf32>
      %c0_10 = arith.constant 0 : index
      %c0_11 = arith.constant 0 : index
      %9 = vector.load %arg4[%c0_10, %c0_11] : memref<1x64xf32, #tpu.memory_space<vmem>>, vector<1x64xf32>
      %cst_12 = arith.constant dense<0.000000e+00> : vector<8xf32>
      %10 = vector.multi_reduction <add>, %7, %cst_12 [1] : vector<8x64xf32> to vector<8xf32>
      %11 = vector.shape_cast %10 : vector<8xf32> to vector<8x1xf32>
      %cst_13 = arith.constant 6.400000e+01 : f32
      %12 = vector.broadcast %cst_13 : f32 to vector<8x1xf32>
      %13 = arith.divf %11, %12 : vector<8x1xf32>
      %14 = vector.broadcast %13 : vector<8x1xf32> to vector<8x64xf32>
      %15 = arith.subf %7, %14 : vector<8x64xf32>
      %16 = arith.mulf %15, %15 : vector<8x64xf32>
      %cst_14 = arith.constant dense<0.000000e+00> : vector<8xf32>
      %17 = vector.multi_reduction <add>, %16, %cst_14 [1] : vector<8x64xf32> to vector<8xf32>
      %18 = vector.shape_cast %17 : vector<8xf32> to vector<8x1xf32>
      %cst_15 = arith.constant 6.400000e+01 : f32
      %19 = vector.broadcast %cst_15 : f32 to vector<8x1xf32>
      %20 = arith.divf %18, %19 : vector<8x1xf32>
      %21 = vector.broadcast %13 : vector<8x1xf32> to vector<8x64xf32>
      %22 = arith.subf %7, %21 : vector<8x64xf32>
      %23 = math.sqrt %20 : vector<8x1xf32>
      %cst_16 = arith.constant 9.99999974E-6 : f32
      %24 = vector.broadcast %cst_16 : f32 to vector<8x1xf32>
      %25 = arith.addf %23, %24 : vector<8x1xf32>
      %26 = vector.broadcast %25 : vector<8x1xf32> to vector<8x64xf32>
      %27 = arith.divf %22, %26 : vector<8x64xf32>
      %28 = vector.broadcast %8 : vector<1x64xf32> to vector<8x64xf32>
      %29 = arith.mulf %27, %28 : vector<8x64xf32>
      %30 = vector.broadcast %9 : vector<1x64xf32> to vector<8x64xf32>
      %31 = arith.addf %29, %30 : vector<8x64xf32>
      %32 = arith.truncf %31 : vector<8x64xf32> to vector<8x64xbf16>
      %c0_17 = arith.constant 0 : index
      %c0_18 = arith.constant 0 : index
      %33 = vector.load %arg7[%c0_17, %c0_18] : memref<8x64xbf16, #tpu.memory_space<vmem>>, vector<8x64xbf16>
      tpu.vector_store %arg7[%c0_17, %c0_18], %32 {strides = array<i32>} : memref<8x64xbf16, #tpu.memory_space<vmem>>, vector<8x64xbf16>,
    } else {
    }
    %c0 = arith.constant 0 : index
    %c0_1 = arith.constant 0 : index
    %3 = vector.load %arg7[%c0, %c0_1] : memref<8x64xbf16, #tpu.memory_space<vmem>>, vector<8x64xbf16>
    %c0_2 = arith.constant 0 : index
    %c0_3 = arith.constant 0 : index
    %4 = vector.load %arg5[%c0_2, %c0_3] : memref<64x128xbf16, #tpu.memory_space<vmem>>, vector<64x128xbf16>
    %cst = arith.constant dense<0.000000e+00> : vector<8x128xf32>
    %5 = tpu.matmul %3, %4, %cst {dimension_numbers = #tpu.dot_dimension_numbers<[1], [0], [0], [1], [0, 0, 1, 1], [], []>} : vector<8x64xbf16>, vector<64x128xbf16>, vector<8x128xf32> -> vector<8x128xf32>
    %c0_4 = arith.constant 0 : index
    %c0_5 = arith.constant 0 : index
    %6 = vector.load %arg6[%c0_4, %c0_5] : memref<8x128xf32, #tpu.memory_space<vmem>>, vector<8x128xf32>
    tpu.vector_store %arg6[%c0_4, %c0_5], %5 {strides = array<i32>} : memref<8x128xf32, #tpu.memory_space<vmem>>, vector<8x128xf32>,
    return
  }
  func.func @transform_0(%arg0: i32, %arg1: i32) -> (i32, i32) {
    %c0_i32 = arith.constant 0 : i32
    %c0_i32_0 = arith.constant 0 : i32
    return %arg0, %c0_i32 : i32, i32
  }
  func.func @transform_1(%arg0: i32, %arg1: i32) -> (i32, i32) {
    %c0_i32 = arith.constant 0 : i32
    %c0_i32_0 = arith.constant 0 : i32
    %c0_i32_1 = arith.constant 0 : i32
    return %c0_i32, %c0_i32_0 : i32, i32
  }
  func.func @transform_2(%arg0: i32, %arg1: i32) -> (i32, i32) {
    %c0_i32 = arith.constant 0 : i32
    %c0_i32_0 = arith.constant 0 : i32
    %c0_i32_1 = arith.constant 0 : i32
    return %c0_i32, %c0_i32_0 : i32, i32
  }
  func.func @transform_3(%arg0: i32, %arg1: i32) -> (i32, i32) {
    %c0_i32 = arith.constant 0 : i32
    %c0_i32_0 = arith.constant 0 : i32
    return %c0_i32, %arg1 : i32, i32
  }
  func.func @transform_4(%arg0: i32, %arg1: i32) -> (i32, i32) {
    %c0_i32 = arith.constant 0 : i32
    return %arg0, %arg1 : i32, i32
  }
}

</mosaic_0001>

<bundles_post_ra>
// kernel: demo_transformer_forward.3
= control target key start
LH: loop header
LB: loop body
LE: loop exit
PB: predicated region body
PF: predicated region fallthrough
CT: control target
= control target key end

     0   :  { %9 = vsyncpa [#allocation4], 0  ;;  %s786_s0 = inlined_call_operand.vmem [shape: f32[16,64], index: 0, kind: input, shape index: {}]   ;;  %s787_s1 = inlined_call_operand.vmem [shape: f32[1,64], index: 1, kind: input, shape index: {}]   ;;  %s788_s2 = inlined_call_operand.vmem [shape: f32[1,64], index: 2, kind: input, shape index: {}]   ;;  %s789_s3 = inlined_call_operand.vmem [shape: bf16[64,128], index: 3, kind: input, shape index: {}]   ;;  %s790_s4 = inlined_call_operand.hbm [shape: f32[16,128], index: 4, kind: output, shape index: {}]  }
   0x1   :  { %11 = vsyncpa [#allocation4 + $0x1], 0  ;;  %s654_s15 = smov 0   ;;  %s656_s16 = smov 0  }
   0x2   :  { %s658_s17 = smov 0   ;;  %s660_s18 = smov 0  }
   0x3   :  { %s662_s19 = smov 0   ;;  %s664_s20 = smov 0  }
   0x4 LB: > { %s447_s21 = sadd.s32 4294967295, %s624_s20   ;;  %s448_s22 = sadd.s32 4294967294, %s624_s20   ;;  %s624_s20 = sphi %s664_s20, %s17_s20   ;;  %s620_s19 = sphi %s662_s19, %s797_s19   ;;  %s616_s18 = sphi %s660_s18, %s796_s18   ;;  %s612_s17 = sphi %s658_s17, %s795_s17   ;;  %s608_s16 = sphi %s656_s16, %s794_s16   ;;  %s604_s15 = sphi %s654_s15, %s793_s15  }
   0x5   : > { %s29_s23 = sadd.s32 1, %s620_s19  ;;  %s132_s24 = sadd.s32 1, %s612_s17 }
   0x6   : > { %p31_p0 = scmp.ge.s32.totalorder %s29_s23, 2  ;;  %p142_p1 = scmp.ne.s32.totalorder %s612_s17, %s608_s16 }
   0x7   : > { %p143_p2 = scmp.eq.s32.totalorder %s447_s21, 1  ;;  %p148_p3 = scmp.ne.s32.totalorder %s608_s16, %s604_s15 }
   0x8   : > { %s799_s23 = smov (%p31_p0, %s29_s23), 0  ;;  %p149_p5 = scmp.eq.s32.totalorder %s448_s22, 1 }
   0x9   : > { %p694_p4 = por %p143_p2, %p142_p1  ;;  %s127_s26 = ssub.s32 %s620_s19, %s799_s23 }
   0xa   : > { %p452_p6 = scmp.ge.s32.totalorder %s624_s20, 1  ;;  %p130_p7 = scmp.eq.s32.totalorder %s127_s26, 0 }
   0xb   : > { %p701_p8 = por %p149_p5, %p148_p3  ;;  %p187_p9 = scmp.lt.s32.totalorder %s624_s20, 3 }
   0xc   : > { %s707_s28 = scalar_select %p130_p7, %s612_s17, %s132_s24  }
   0xd   : > { %p188_p10 = pnand %p452_p6, %p187_p9 }
   0xe   : > { %p216_p11 = scmp.lt.s32.totalorder (!%p188_p10), %s616_s18, 1  ;;  %s463_s8 = sshll.u32 (!%p188_p10), %s616_s18, 7 }
   0xf   : > { %191 = sbr.rel (%p188_p10) target bundleno = 570 (0x23a), region = 36  ;;  %s742_s11 = scalar_lea.hbm (!%p188_p10), %s790_s4, %s463_s8 }
  0x14   : > { %s217_s29 = scalar_select %p216_p11, %s616_s18, 1  ;;  %vm232_vm0 = vcmask 523264   ;;  %v540_v7 = vld [vmem:[%s789_s3 + $0x18] sm:$0xff]   ;;  %v626_v8 = vmov 0.0   ;;  %v541_v9 = vld [vmem:[%s789_s3 + $0x10] sm:$0xff]   ;;  %vm627_vm1 = vmmov 0  }
  0x15   : > { %471 = vmatprep.subr.bf16.mxu0 %v626_v8  ;;  %479 = vmatprep.mubr.msk.bf16.mxu0 %vm627_vm1, %v626_v8  ;;  %v542_v10 = vld [vmem:[%s789_s3 + $0x8] sm:$0xff]   ;;  %v543_v11 = vld [vmem:[%s789_s3] sm:$0xff]   ;;  %vm269_vm4 = vcmask 519168   ;;  %s628_s18 = smov [#allocation3]  }
  0x16   : > { %s454_s30 = sshll.u32 %s217_s29, 3  ;;  %472 = vmatpush3.bf16.msra.mxu0 %v540_v7  ;;  %v455_v21 = vld [vmem:[%s787_s1] ss:$0 sm:$0xff]  ;;  %s552_s14 = sshll.u32 %s628_s18, 4  ;;  %s553_s14 = int_to_ptr.vmem [resolvable:$false] %s552_s14 }
  0x17   : > { %s219_s7 = scalar_lea.vmem %s786_s0, %s454_s30  ;;  %473 = vmatprep.subr.bf16.mxu0 %v626_v8  ;;  %v456_v23 = vld [vmem:[%s788_s2] ss:$0 sm:$0xff]  ;;  %s213_s30 = sand.u32 1, %s608_s16  }
  0x18   : > { %v229_v0 = vld [vmem:[%s219_s7] sm:$0xff]  ;;  %s453_s5 = sshll.u32 %s213_s30, 3  ;;  %s350_s12 = scalar_lea.sflag [#allocation4], %s213_s30 }
  0x19   : > { %v233_v1 = vsel %vm232_vm0, %v229_v0, 0.0  ;;  %s215_s6 = scalar_lea.vmem [#allocation3], %s453_s5  ;;  %s554_s21 = scalar_lea.vmem %s553_s14, 256 }
  0x1a   : > { %234 = vadd.xlane.f32.xlu0 %v233_v1  ;;  %474 = vmatpush3.bf16.msra.mxu0 %v541_v9  ;;  %s364_s7 = sshll.u32 %s215_s6, 4  ;;  %s737_s7 = int_to_ptr.vmem [resolvable:$true] %s364_s7 }
  0x1b   : > { %475 = vmatprep.subr.bf16.mxu0 %v626_v8  ;;  %s548_s13 = scalar_lea.vmem %s737_s7, 128  ;;  %p555_p1 = scmp.lt.s32.totalorder %s737_s7, %s553_s14 }
  0x1c   : > { %p549_p12 = scmp.ne.s32.totalorder %s737_s7, %s548_s13  ;;  %p556_p2 = scmp.lt.s32.totalorder %s554_s21, %s548_s13 }
  0x1e   : > { %476 = vmatpush3.bf16.msra.mxu0 %v542_v10  ;;  %p550_p13 = pnand %p549_p12, %p694_p4  ;;  %p557_p3 = por %p556_p2, %p555_p1 }
  0x1f   : > { %477 = vmatprep.subr.bf16.mxu0 %v626_v8 }
  0x20   : > { %p551_p0 = pneg %p550_p13 }
  0x22   : > { %478 = vmatpush3.bf16.msra.mxu0 %v543_v11  ;;  %p558_p5 = pnand %p557_p3, %p551_p0 }
  0xa3   : > { %v235_v2 = vpop.xlane.xlu0 %234 }
  0xa4   : > { %v237_v3 = vmul.f32 0.015625, %v235_v2 }
  0xa6   : > { %v238_v4 = vsub.f32 %v229_v0, %v237_v3 }
  0xa8   : > { %v239_v5 = vmul.f32 %v238_v4, %v238_v4 }
  0xaa   : > { %v240_v6 = vsel %vm232_vm0, %v239_v5, 0.0 }
  0xab   : > { %241 = vadd.xlane.f32.xlu0 %v240_v6 }
 0x134   : > { %v242_v12 = vpop.xlane.xlu0 %241 }
 0x135   : > { %v243_v13 = vmul.f32 0.015625, %v242_v12 }
 0x137   : > { %544 = vrsqrt.f32 %v243_v13  ;;  %vm246_vm2 = vcmp.eq.f32.partialorder %v243_v13, inf  ;;  %v249_v16 = vand.u32 2147483648, %v243_v13  ;;  %vm248_vm3 = vcmp.eq.f32.partialorder %v243_v13, 0.0 }
 0x144   : > { %v545_v14 = vpop.eup %544 }
 0x145   : > { %v245_v15 = vmul.f32 %v545_v14, %v243_v13 }
 0x147   : > { %v247_v17 = vsel %vm246_vm2, %v243_v13, %v245_v15 }
 0x148   : > { %v250_v18 = vsel %vm248_vm3, %v249_v16, %v247_v17 }
 0x149   : > { %v251_v19 = vadd.f32 1e-05, %v250_v18 }
 0x14b   : > { %546 = vrcp.f32 %v251_v19 }
 0x158   : > { %v547_v20 = vpop.eup %546 }
 0x159   : > { %v253_v22 = vmul.f32 %v547_v20, %v238_v4 }
 0x15b   : > { %v260_v24 = vmul.f32 %v455_v21, %v253_v22 }
 0x15d   : > { %v267_v25 = vadd.f32 %v456_v23, %v260_v24 }
 0x15f   : > { %v268_v26 = vpack.c.bf16 %v267_v25, %v267_v25 }
 0x161   : > { %270 = vst.msk [vmem:[#allocation2] sm:$0xf] %vm269_vm4, %v268_v26 }
 0x168   : > { %v271_v27 = vld [vmem:[#allocation2] sm:$0xf] }
 0x169   : > { %480 = vmatmul.mubr.msk.bf16.vlgmr.msra.gmra.mxu0 %vm232_vm0, %v271_v27 }
 0x229   : > { %v342_v28 = vpop.f32.mrf.mxu0 }
 0x22a   : > { %348 = vst [vmem:[%s215_s6] sm:$0xff] %v342_v28 }
 0x22b   : > { %v481_v29 = vpop.f32.mrf.mxu0 }
 0x22c   : > { %561 = shalt.err (!%p558_p5)
}
 0x22d   : > { %s562_s22 = scalar_lea.hbm %s742_s11, 128  ;;  %s566_s29 = scalar_lea.hbm %s790_s4, 256 }
 0x22e   : > { %p563_p6 = scmp.ne.s32.totalorder %s742_s11, %s562_s22  ;;  %p567_p10 = scmp.lt.s32.totalorder %s742_s11, %s790_s4 }
 0x22f   : > { %p568_p11 = scmp.lt.s32.totalorder %s566_s29, %s562_s22 }
 0x230   : > { %p564_p7 = pnand %p563_p6, %p694_p4 }
 0x231   : > { %p569_p12 = por %p568_p11, %p567_p10 }
 0x232   : > { %p565_p9 = pneg %p564_p7 }
 0x234   : > { %p570_p13 = pnand %p569_p12, %p565_p9 }
 0x236   : > { %573 = shalt.err (!%p570_p13)
}
 0x237   : > { %483 = dma.vmem_to_hbm [thread:$0]  (%p694_p4), %s737_s7, 128, %s742_s11, %s350_s12   ;;  %v345_v30 = vpop.f32.mrf.mxu0 }
 0x239   : > { %v482_v31 = vpop.f32.mrf.mxu0 }
 0x23a PF: > { %p489_p0 = scmp.ge.s32.totalorder %s624_s20, 2  ;;  %s376_s6 = sand.u32 1, %s604_s15  }
 0x23b   : > { %s377_s8 = scalar_lea.sflag [#allocation4], %s376_s6 }
 0x23c   : > { %p486_p1 = pnand %p489_p0, %p701_p8 }
 0x23e   : > { %p487_p2 = pneg %p486_p1 }
 0x240   : > { %599 = dma.done.wait (%p487_p2), %s377_s8, 128  }
 0x241   : > { %601 = vsyncadd (%p487_p2), %s377_s8, 4294967168  ;;  %s17_s20 = sadd.s32 1, %s624_s20   ;;  %s793_s15 = smov %s608_s16 }
 0x242   : > { %p14_p3 = scmp.ge.s32.totalorder %s17_s20, 4   ;;  %s794_s16 = smov %s612_s17 }
 0x243   : > { %s795_s17 = smov %s707_s28  ;;  %s796_s18 = smov %s620_s19 }
 0x244   : > { %s797_s19 = smov %s799_s23  ;;  %16 = sbr.rel (!%p14_p3) target bundleno = 4 (0x4), region = 78 }
 0x249   :  { %382 = vsyncpa [#allocation4], 1 }
 0x24a   :  { %384 = vsyncpa [#allocation4 + $0x1], 1 }

// kernel: demo_transformer_forward.2
= control target key start
LH: loop header
LB: loop body
LE: loop exit
PB: predicated region body
PF: predicated region fallthrough
CT: control target
= control target key end

     0   :  { %s2801_s29 = smov 0   ;;  %s2803_s30 = smov 0   ;;  %s3183_s0 = inlined_call_operand.vmem [shape: f32[2,8,64], index: 0, kind: input, shape index: {}, may-alias: {0,14}]   ;;  %s3184_s1 = inlined_call_operand.vmem [shape: f32[8,8], index: 1, kind: input, shape index: {}]   ;;  %s3185_s2 = inlined_call_operand.vmem [shape: f32[2,1,64], index: 2, kind: input, shape index: {}]   ;;  %s3186_s3 = inlined_call_operand.vmem [shape: f32[2,1,64], index: 3, kind: input, shape index: {}]   ;;  %s3187_s4 = inlined_call_operand.vmem [shape: bf16[2,64,192], index: 4, kind: input, shape index: {}]   ;;  %s3188_s5 = inlined_call_operand.vmem [shape: f32[2,1,192], index: 5, kind: input, shape index: {}]   ;;  %s3189_s6 = inlined_call_operand.vmem [shape: bf16[2,64,64], index: 6, kind: input, shape index: {}]   ;;  %s3190_s7 = inlined_call_operand.vmem [shape: f32[2,1,64], index: 7, kind: input, shape index: {}]   ;;  %s3191_s8 = inlined_call_operand.vmem [shape: f32[2,1,64], index: 8, kind: input, shape index: {}]   ;;  %s3192_s9 = inlined_call_operand.vmem [shape: f32[2,1,64], index: 9, kind: input, shape index: {}]   ;;  %s3193_s10 = inlined_call_operand.vmem [shape: bf16[2,64,128], index: 10, kind: input, shape index: {}]   ;;  %s3194_s11 = inlined_call_operand.vmem [shape: f32[2,1,128], index: 11, kind: input, shape index: {}]   ;;  %s3195_s12 = inlined_call_operand.vmem [shape: bf16[2,128,64], index: 12, kind: input, shape index: {}]   ;;  %s3196_s13 = inlined_call_operand.vmem [shape: f32[2,1,64], index: 13, kind: input, shape index: {}]   ;;  %s3197_s14 = inlined_call_operand.vmem [shape: f32[2,8,64], index: 14, kind: output, shape index: {}, may-alias: {0,14}]  }
   0x1   :  { %3203 = sst [smem:[#allocation9_spill]] %s3183_s0  ;;  %s2805_s15 = smov 0  }
   0x2   :  { %3204 = sst [smem:[#allocation10_spill]] %s3184_s1  ;;  %s2807_s16 = smov 0  }
   0x3   :  { %3205 = sst [smem:[#allocation11_spill]] %s3186_s3  ;;  %s2809_s17 = smov 0  }
   0x4   :  { %3206 = sst [smem:[#allocation12_spill]] %s3187_s4 }
   0x5   :  { %3207 = sst [smem:[#allocation13_spill]] %s3188_s5 }
   0x6   :  { %3208 = sst [smem:[#allocation14_spill]] %s3189_s6 }
   0x7   :  { %3209 = sst [smem:[#allocation15_spill]] %s3197_s14 }
   0x8 LB: > { %3210 = sst [smem:[#allocation2_spill]] %s2696_s29  ;;  %s33_s18 = sadd.s32 1, %s2704_s15  ;;  %s2712_s17 = sphi %s2809_s17, %s24_s17   ;;  %s2708_s16 = sphi %s2807_s16, %s3236_s16   ;;  %s2704_s15 = sphi %s2805_s15, %s3235_s15   ;;  %s2700_s30 = sphi %s2803_s30, %s3234_s30   ;;  %s2696_s29 = sphi %s2801_s29, %s3233_s29  }
   0x9   : > { %3211 = sst [smem:[#allocation3_spill]] %s2704_s15  ;;  %s36_s19 = sadd.s32 1, %s2708_s16 }
   0xa   : > { %3212 = sst [smem:[#allocation4_spill]] %s2708_s16  ;;  %p34_p0 = scmp.ge.s32.totalorder %s33_s18, 2 }
   0xb   : > { %3213 = sst [smem:[#allocation5_spill]] %s2712_s17  ;;  %p2372_p1 = scmp.ge.s32.totalorder %s2712_s17, 1 }
   0xc   : > { %p528_p2 = scmp.lt.s32.totalorder %s2712_s17, 5  ;;  %s3238_s18 = smov (%p34_p0, %s33_s18), 0 }
   0xd   : > { %3214 = sst [smem:[#allocation6_spill]] %s3238_s18  ;;  %s3240_s19 = smov (!%p34_p0, %s36_s19), %s2708_s16 }
   0xe   : > { %p529_p3 = pnand %p2372_p1, %p528_p2  ;;  %p38_p4 = scmp.ge.s32.totalorder %s3240_s19, 2 }
  0x10   : > { %s3242_s19 = smov (%p38_p4, %s3240_s19), 0  ;;  %532 = sbr.rel (%p529_p3) target bundleno = 2700 (0xa8c), region = 76 }
  0x11   : > { %3215 = sst [smem:[#allocation7_spill]] %s3242_s19 }
  0x15   : > { %p617_p5 = scmp.lt.s32.totalorder %s2700_s30, 1  ;;  %p621_p6 = scmp.lt.s32.totalorder %s2696_s29, 1 }
  0x16   : > { %s3216_s0 = sld [smem:[#allocation9_spill]] }
  0x17   : > { %s3244_s30 = smov (!%p617_p5, %s2700_s30), 1  ;;  %s3218_s4 = sld [smem:[#allocation12_spill]] }
  0x18   : > { %s2835_s20 = scalar_select %p621_p6, %s2696_s29, 1 }
  0x19   : > { %s2373_s21 = sshll.u32 %s3244_s30, 3  ;;  %s3219_s5 = sld [smem:[#allocation13_spill]] }
  0x1a   : > { %s2437_s16 = sshll.u32 %s2835_s20, 6  ;;  %s2376_s30 = sshll.u32 %s2835_s20, 1 }
  0x1b   : > { %s2438_s23 = sshll.u32 %s2835_s20, 5  ;;  %s3220_s6 = sld [smem:[#allocation14_spill]] }
  0x1c   : > { %s620_s24 = scalar_lea.vmem %s3216_s0, %s2373_s21  ;;  %s2890_s28 = scalar_lea.vmem %s3195_s12, %s2437_s16 }
  0x1d   : > { %s2852_s1 = scalar_lea.vmem %s3218_s4, %s2437_s16  ;;  %s665_s17 = scalar_lea.vmem %s3196_s13, %s2835_s20 }
  0x1e   : > { %s3222_s14 = sld [smem:[#allocation15_spill]] }
  0x1f   : > { %s2858_s22 = scalar_lea.vmem %s3219_s5, %s2376_s30  ;;  %s2881_s5 = scalar_lea.vmem %s3193_s10, %s2438_s23 }
  0x21   : > { %s2864_s26 = scalar_lea.vmem %s3220_s6, %s2438_s23  ;;  %s657_s6 = scalar_lea.vmem %s3194_s11, %s2835_s20 }
  0x22   : > { %3221 = sst [smem:[#allocation8_spill]] %s2864_s26 }
  0x23   : > { %s3223_s23 = sld [smem:[#allocation2_spill]] }
  0x24   : > { %s2899_s18 = scalar_lea.vmem %s3222_s14, %s2373_s21 }
  0x29   : > { %p2384_p7 = scmp.ne.s32.totalorder %s3223_s23, 0 }
  0x2b   : > { %674 = sbr.rel (%p2384_p7) target bundleno = 50 (0x32), region = 80 }
  0x30   : > { %v675_v0 = vld [vmem:[%s620_s24] sm:$0xff]  ;;  %vm676_vm0 = vcmask 523264  }
  0x31   : > { %677 = vst.msk [vmem:[%s2899_s18] sm:$0xff] %vm676_vm0, %v675_v0 }
  0x32 PF: > { %vm681_vm1 = vcmask 523264   ;;  %v2620_v8 = vld [vmem:[%s2852_s1 + $0x34] ss:$8 sps:$4 sm:$0xff]   ;;  %v2622_v9 = vld [vmem:[%s2852_s1 + $0x30] ss:$8 sps:$4 sm:$0xff]   ;;  %v2714_v12 = vmov 0   ;;  %s3224_s21 = scalar_lea.vmem %s3185_s2, %s2835_s20  ;;  %v728_v32 = vlaneseq  ;;  %s3229_s24 = scalar_lea.vmem %s3190_s7, %s2835_s20 }
  0x33   : > { %v2623_v10 = vld [vmem:[%s2852_s1 + $0x24] ss:$8 sps:$4 sm:$0xff]   ;;  %789 = vmatprep.subr.bf16.mxu1 %v2620_v8  ;;  %v2625_v11 = vld [vmem:[%s2852_s1 + $0x20] ss:$8 sps:$4 sm:$0xff]   ;;  %813 = vmatprep.mubr.bf16.mxu1 %v2714_v12  ;;  %v2626_v13 = vld [vmem:[%s2852_s1 + $0x14] ss:$8 sps:$4 sm:$0xff]  }
  0x34   : > { %790 = vmatpush1.bf16.msra.mxu1 %v2622_v9  ;;  %v2628_v14 = vld [vmem:[%s2852_s1 + $0x10] ss:$8 sps:$4 sm:$0xff]   ;;  %v2629_v15 = vld [vmem:[%s2852_s1 + $0x4] ss:$8 sps:$4 sm:$0xff]   ;;  %v2631_v16 = vld [vmem:[%s2852_s1] ss:$8 sps:$4 sm:$0xff]  }
  0x35   : > { %791 = vmatprep.subr.bf16.mxu1 %v2623_v10  ;;  %v2385_v26 = vld [vmem:[%s3224_s21] ss:$0 sm:$0xff]  ;;  %s3225_s14 = sld [smem:[#allocation11_spill]]  ;;  %v2929_v33 = vshrl.u32 %v728_v32, 7  ;;  %s2715_s30 = smov 80   ;;  %v2721_v61 = vmov 0.0  }
  0x36   : > { %v2933_v35 = vld [vmem:[%s2858_s22] sm:$0x3]  ;;  %s2716_s0 = smov 112   ;;  %s2717_s25 = smov 96   ;;  %v2719_v42 = vmov 1983009808   ;;  %2488 = vmatprep.subr.bf16.mxu0 %v2721_v61 }
  0x37   : > { %v730_v34 = vsub.s32 0, %v2929_v33  ;;  %s2718_s19 = smov 64   ;;  %v835_v43 = vunpack.c.l.s4 %v2719_v42  ;;  %v2720_v45 = vmov 1934713408   ;;  %vm2722_vm4 = vmmov 0   ;;  %s3227_s15 = sld [smem:[#allocation10_spill]] }
  0x38   : > { %v2904_v1 = vld [vmem:[%s2899_s18] sm:$0xff]  ;;  %792 = vmatpush1.bf16.msra.mxu1 %v2625_v11  ;;  %v867_v46 = vunpack.c.l.s4 %v2720_v45  ;;  %2490 = vmatprep.mubr.msk.bf16.mxu0 %vm2722_vm4, %v2721_v61  ;;  %vm1274_vm5 = vcmask 130048   ;;  %vm1468_vm6 = vcmask 64512   ;;  %vm1520_vm7 = vcmask 1043456   ;;  %s3228_s3 = sld [smem:[#allocation8_spill]]  ;;  %s2723_s4 = smov 32  }
  0x39   : > { %v682_v2 = vsel %vm681_vm1, %v2904_v1, 0.0  ;;  %793 = vmatprep.subr.bf16.mxu1 %v2626_v13  ;;  %v731_v36 = vrot.slane %v2933_v35, %v730_v34  ;;  %v836_v44 = vunpack.c.0.s8 %v835_v43  ;;  %s2724_s23 = smov 16   ;;  %s2725_s16 = smov 48   ;;  %vm1851_vm8 = vcmask 261120  }
  0x3a   : > { %683 = vadd.xlane.f32.xlu0 %v682_v2  ;;  %v868_v50 = vunpack.c.0.s8 %v867_v46  ;;  %vm1853_vm9 = vcmask 392192  }
  0x3b   : > { %s3226_s29 = scalar_lea.vmem %s3225_s14, %s2835_s20  ;;  %v2942_v49 = vsub.s32 %v836_v44, %v2929_v33  ;;  %s3230_s14 = scalar_lea.vmem %s3191_s8, %s2835_s20 }
  0x3c   : > { %794 = vmatpush1.bf16.msra.mxu1 %v2628_v14  ;;  %v2386_v28 = vld [vmem:[%s3226_s29] ss:$0 sm:$0xff]  ;;  %v2945_v56 = vsub.s32 %v868_v50, %v2929_v33 }
  0x3d   : > { %795 = vmatprep.subr.bf16.mxu1 %v2629_v15 }
  0x40   : > { %796 = vmatpush1.bf16.msra.mxu1 %v2631_v16 }
  0x41   : > { %2476 = vmatprep.subr.bf16.mxu1 %v2721_v61 }
  0xc3   : > { %v684_v3 = vpop.xlane.xlu0 %683 }
  0xc4   : > { %v686_v4 = vmul.f32 0.015625, %v684_v3 }
  0xc6   : > { %v687_v5 = vsub.f32 %v2904_v1, %v686_v4 }
  0xc8   : > { %v688_v6 = vmul.f32 %v687_v5, %v687_v5 }
  0xca   : > { %v689_v7 = vsel %vm681_vm1, %v688_v6, 0.0 }
  0xcb   : > { %690 = vadd.xlane.f32.xlu0 %v689_v7 }
 0x154   : > { %v691_v17 = vpop.xlane.xlu0 %690 }
 0x155   : > { %v692_v18 = vmul.f32 0.015625, %v691_v17 }
 0x157   : > { %2648 = vrsqrt.f32 %v692_v18  ;;  %vm695_vm2 = vcmp.eq.f32.partialorder %v692_v18, inf  ;;  %v698_v21 = vand.u32 2147483648, %v692_v18  ;;  %vm697_vm3 = vcmp.eq.f32.partialorder %v692_v18, 0.0 }
 0x164   : > { %v2649_v19 = vpop.eup %2648 }
 0x165   : > { %v694_v20 = vmul.f32 %v2649_v19, %v692_v18 }
 0x167   : > { %v696_v22 = vsel %vm695_vm2, %v692_v18, %v694_v20 }
 0x168   : > { %v699_v23 = vsel %vm697_vm3, %v698_v21, %v696_v22 }
 0x169   : > { %v700_v24 = vadd.f32 1e-05, %v699_v23 }
 0x16b   : > { %2650 = vrcp.f32 %v700_v24 }
 0x178   : > { %v2651_v25 = vpop.eup %2650 }
 0x179   : > { %v702_v27 = vmul.f32 %v2651_v25, %v687_v5 }
 0x17b   : > { %v709_v29 = vmul.f32 %v2385_v26, %v702_v27 }
 0x17d   : > { %v716_v30 = vadd.f32 %v2386_v28, %v709_v29 }
 0x17f   : > { %v717_v31 = vpack.c.bf16 %v716_v30, %v716_v30 }
 0x181   : > { %2395 = vmatmul.mubr.msk.bf16.vlgmr.msra.gmra.mxu1 %vm681_vm1, %v717_v31 }
 0x182   : > { %2478 = vmatprep.mubr.msk.bf16.mxu1 %vm2722_vm4, %v2721_v61 }
 0x241   : > { %v815_v37 = vpop.f32.mrf.mxu1 }
 0x242   : > { %v816_v38 = vadd.f32 %v815_v37, %v731_v36 }
 0x243   : > { %v2936_v39 = vpop.f32.mrf.mxu1 }
 0x244   : > { %829 = vrot.lane.b32.xlu0 %v816_v38, %s2715_s30  ;;  %823 = vrot.lane.b32.xlu1 %v816_v38, %s2716_s0 }
 0x245   : > { %v819_v40 = vpop.f32.mrf.mxu1 }
 0x247   : > { %v820_v41 = vpop.f32.mrf.mxu1 }
 0x248   : > { %826 = vrot.lane.b32.xlu1 %v816_v38, %s2717_s25 }
 0x24c   : > { %972 = vrot.lane.b32.xlu1 %v816_v38, %s2718_s19 }
 0x2b6   : > { %v830_v47 = vpop.permute.xlu0 %829  ;;  %v824_v48 = vpop.permute.xlu1 %823 }
 0x2b7   : > { %974 = vrot.lane.b32.xlu1 %v824_v48, %s2718_s19  ;;  %v848_v51 = vcombine.low %v824_v48, %v830_v47  ;;  %v849_v52 = vcombine.high %v824_v48, %v830_v47 }
 0x2b9   : > { %v856_v57 = vrot.slane %v848_v51, %v2942_v49  ;;  %v863_v58 = vrot.slane %v849_v52, %v2942_v49 }
 0x2ba   : > { %v827_v53 = vpop.permute.xlu1 %826 }
 0x2bb   : > { %v832_v54 = vcombine.low %v816_v38, %v827_v53  ;;  %v833_v55 = vcombine.high %v816_v38, %v827_v53  ;;  %976 = vrot.lane.b32.xlu1 %v827_v53, %s2718_s19 }
 0x2bd   : > { %v840_v59 = vrot.slane %v832_v54, %v2942_v49  ;;  %v847_v60 = vrot.slane %v833_v55, %v2942_v49 }
 0x2be   : > { %v973_v27 = vpop.permute.xlu1 %972 }
 0x2bf   : > { %v864_v62 = vcombine.low %v840_v59, %v856_v57  ;;  %v865_v63 = vcombine.high %v840_v59, %v856_v57  ;;  %v880_v0 = vcombine.low %v847_v60, %v863_v58  ;;  %v881_v2 = vcombine.high %v847_v60, %v863_v58  ;;  %978 = vrot.lane.b32.xlu1 %v830_v47, %s2718_s19 }
 0x2c1   : > { %v872_v3 = vrot.slane %v864_v62, %v2945_v56  ;;  %v879_v4 = vrot.slane %v865_v63, %v2945_v56  ;;  %v888_v5 = vrot.slane %v880_v0, %v2945_v56  ;;  %v895_v6 = vrot.slane %v881_v2, %v2945_v56 }
 0x2c3   : > { %v900_v7 = vcombine.low %v872_v3, %v879_v4  ;;  %v2396_v8 = vcombine.high %v872_v3, %v879_v4  ;;  %v916_v9 = vcombine.low %v888_v5, %v895_v6  ;;  %v2397_v10 = vcombine.high %v888_v5, %v895_v6 }
 0x2c5   : > { %v907_v11 = vrot.slane %v900_v7, %v2942_v49  ;;  %v915_v12 = vrot.slane %v2396_v8, %v2942_v49  ;;  %v923_v13 = vrot.slane %v916_v9, %v2942_v49  ;;  %v931_v14 = vrot.slane %v2397_v10, %v2942_v49 }
 0x2c7   : > { %v932_v15 = vcombine.low %v907_v11, %v915_v12  ;;  %v948_v16 = vcombine.low %v923_v13, %v931_v14  ;;  %v933_v17 = vcombine.high %v907_v11, %v915_v12  ;;  %v949_v18 = vcombine.high %v923_v13, %v931_v14 }
 0x2c9   : > { %v940_v19 = vrot.slane %v932_v15, %v2945_v56  ;;  %v956_v20 = vrot.slane %v948_v16, %v2945_v56  ;;  %v947_v21 = vrot.slane %v933_v17, %v2945_v56  ;;  %v963_v22 = vrot.slane %v949_v18, %v2945_v56 }
 0x2cb   : > { %v964_v23 = vcombine.low %v940_v19, %v956_v20  ;;  %v2969_v24 = vcombine.high %v940_v19, %v956_v20  ;;  %v966_v25 = vcombine.low %v947_v21, %v963_v22  ;;  %v2971_v26 = vcombine.high %v947_v21, %v963_v22 }
 0x2cd   : > { %v968_v14 = vpack.c.bf16 %v964_v23, %v964_v23  ;;  %v970_v15 = vpack.c.bf16 %v966_v25, %v966_v25  ;;  %v969_v19 = vpack.c.bf16 %v2969_v24, %v2969_v24  ;;  %v971_v21 = vpack.c.bf16 %v2971_v26, %v2971_v26  ;;  %v1463_v24 = vld [vmem:[%s3227_s15] sm:$0xff] }
 0x329   : > { %v975_v28 = vpop.permute.xlu1 %974 }
 0x32d   : > { %v977_v29 = vpop.permute.xlu1 %976 }
 0x32e   : > { %v984_v30 = vcombine.low %v973_v27, %v977_v29  ;;  %v985_v31 = vcombine.high %v973_v27, %v977_v29 }
 0x330   : > { %v992_v37 = vrot.slane %v984_v30, %v2942_v49  ;;  %v999_v38 = vrot.slane %v985_v31, %v2942_v49 }
 0x331   : > { %v979_v32 = vpop.permute.xlu1 %978 }
 0x332   : > { %v1000_v34 = vcombine.low %v975_v28, %v979_v32  ;;  %v1001_v36 = vcombine.high %v975_v28, %v979_v32 }
 0x334   : > { %v1008_v40 = vrot.slane %v1000_v34, %v2942_v49  ;;  %v1015_v41 = vrot.slane %v1001_v36, %v2942_v49 }
 0x336   : > { %v1016_v42 = vcombine.low %v992_v37, %v1008_v40  ;;  %v1017_v43 = vcombine.high %v992_v37, %v1008_v40  ;;  %v1032_v44 = vcombine.low %v999_v38, %v1015_v41  ;;  %v1033_v45 = vcombine.high %v999_v38, %v1015_v41 }
 0x338   : > { %v1024_v46 = vrot.slane %v1016_v42, %v2945_v56  ;;  %v1031_v47 = vrot.slane %v1017_v43, %v2945_v56  ;;  %v1040_v48 = vrot.slane %v1032_v44, %v2945_v56  ;;  %v1047_v50 = vrot.slane %v1033_v45, %v2945_v56 }
 0x33a   : > { %v1052_v51 = vcombine.low %v1024_v46, %v1031_v47  ;;  %v2398_v52 = vcombine.high %v1024_v46, %v1031_v47  ;;  %v1068_v53 = vcombine.low %v1040_v48, %v1047_v50  ;;  %v2399_v54 = vcombine.high %v1040_v48, %v1047_v50 }
 0x33b   : > { %v734_v48 = vsub.s32 1, %v2929_v33 }
 0x33c   : > { %v1059_v55 = vrot.slane %v1052_v51, %v2942_v49  ;;  %v1067_v57 = vrot.slane %v2398_v52, %v2942_v49  ;;  %v1075_v58 = vrot.slane %v1068_v53, %v2942_v49  ;;  %v1083_v59 = vrot.slane %v2399_v54, %v2942_v49 }
 0x33d   : > { %v735_v54 = vrot.slane %v2933_v35, %v734_v48 }
 0x33e   : > { %v1084_v60 = vcombine.low %v1059_v55, %v1067_v57  ;;  %v1100_v62 = vcombine.low %v1075_v58, %v1083_v59  ;;  %v1085_v63 = vcombine.high %v1059_v55, %v1067_v57  ;;  %v1101_v0 = vcombine.high %v1075_v58, %v1083_v59 }
 0x33f   : > { %v818_v58 = vadd.f32 %v2936_v39, %v735_v54 }
 0x340   : > { %v1092_v2 = vrot.slane %v1084_v60, %v2945_v56  ;;  %v1108_v3 = vrot.slane %v1100_v62, %v2945_v56  ;;  %v1099_v4 = vrot.slane %v1085_v63, %v2945_v56  ;;  %v1115_v5 = vrot.slane %v1101_v0, %v2945_v56 }
 0x342   : > { %v1116_v6 = vcombine.low %v1092_v2, %v1108_v3  ;;  %v1118_v7 = vcombine.low %v1099_v4, %v1115_v5  ;;  %v1117_v12 = vcombine.high %v1092_v2, %v1108_v3  ;;  %v1119_v17 = vcombine.high %v1099_v4, %v1115_v5 }
 0x344   : > { %v1120_v8 = vpack.c.bf16 %v1116_v6, %v1116_v6  ;;  %v1122_v9 = vpack.c.bf16 %v1118_v7, %v1118_v7  ;;  %v1121_v13 = vpack.c.bf16 %v1117_v12, %v1117_v12  ;;  %v1123_v18 = vpack.c.bf16 %v1119_v17, %v1119_v17 }
 0x346   : > { %v1279_v10 = vsel %vm1274_vm5, %v1120_v8, 0  ;;  %v1371_v11 = vsel %vm1274_vm5, %v1122_v9, 0  ;;  %v1325_v16 = vsel %vm1274_vm5, %v1121_v13, 0  ;;  %v1417_v20 = vsel %vm1274_vm5, %v1123_v18, 0 }
 0x347   : > { %2477 = vmatpush3.bf16.xpose.msra.mxu1 %v1279_v10  ;;  %2489 = vmatpush3.bf16.xpose.msra.mxu0 %v1371_v11 }
 0x348   : > { %2482 = vmatprep.subr.bf16.mxu1 %v2721_v61  ;;  %2500 = vmatprep.subr.bf16.mxu0 %v2721_v61 }
 0x34e   : > { %2479 = vmatmul.mubr.msk.bf16.vlgmr.msra.gmra.mxu1 %vm1274_vm5, %v968_v14  ;;  %2491 = vmatmul.mubr.msk.bf16.vlgmr.msra.gmra.mxu0 %vm1274_vm5, %v970_v15 }
 0x34f   : > { %2483 = vmatpush3.bf16.xpose.msra.mxu1 %v1325_v16  ;;  %2484 = vmatprep.mubr.msk.bf16.mxu1 %vm2722_vm4, %v2721_v61 }
 0x350   : > { %2494 = vmatprep.subr.bf16.mxu1 %v2721_v61  ;;  %2502 = vmatprep.mubr.msk.bf16.mxu0 %vm2722_vm4, %v2721_v61 }
 0x356   : > { %2485 = vmatmul.mubr.msk.bf16.vlgmr.msra.gmra.mxu1 %vm1274_vm5, %v969_v19 }
 0x357   : > { %2495 = vmatpush3.bf16.xpose.msra.mxu1 %v1417_v20  ;;  %2496 = vmatprep.mubr.msk.bf16.mxu1 %vm2722_vm4, %v2721_v61 }
 0x358   : > { %2506 = vmatprep.subr.bf16.mxu1 %v2721_v61 }
 0x35e   : > { %2497 = vmatmul.mubr.msk.bf16.vlgmr.msra.gmra.mxu1 %vm1274_vm5, %v971_v21 }
 0x35f   : > { %2508 = vmatprep.mubr.msk.bf16.mxu1 %vm2722_vm4, %v2721_v61 }
 0x40e   : > { %v1315_v22 = vpop.f32.mrf.mxu1  ;;  %v1407_v23 = vpop.f32.mrf.mxu0 }
 0x40f   : > { %v1459_v25 = vmul.f32 0.25, %v1315_v22  ;;  %v1461_v27 = vmul.f32 0.25, %v1407_v23 }
 0x410   : > { %v2480_v28 = vpop.f32.mrf.mxu1  ;;  %v2492_v29 = vpop.f32.mrf.mxu0 }
 0x411   : > { %v1464_v30 = vadd.f32 %v1463_v24, %v1459_v25  ;;  %v1466_v34 = vadd.f32 %v1463_v24, %v1461_v27 }
 0x412   : > { %v1318_v31 = vpop.f32.mrf.mxu1  ;;  %v1410_v32 = vpop.f32.mrf.mxu0 }
 0x413   : > { %v1469_v26 = vsel %vm1468_vm6, %v1464_v30, -inf  ;;  %v1475_v41 = vsel %vm1468_vm6, %v1466_v34, -inf }
 0x414   : > { %v2493_v36 = vpop.f32.mrf.mxu0  ;;  %1470 = vmax.xlane.f32.xlu1 %v1469_v26  ;;  %v2481_v37 = vpop.f32.mrf.mxu1 }
 0x416   : > { %v1361_v38 = vpop.f32.mrf.mxu1 }
 0x417   : > { %v1460_v40 = vmul.f32 0.25, %v1361_v38 }
 0x418   : > { %1476 = vmax.xlane.f32.xlu1 %v1475_v41  ;;  %v2486_v42 = vpop.f32.mrf.mxu1 }
 0x419   : > { %v1465_v43 = vadd.f32 %v1463_v24, %v1460_v40 }
 0x41a   : > { %v1364_v44 = vpop.f32.mrf.mxu1 }
 0x41b   : > { %v1472_v45 = vsel %vm1468_vm6, %v1465_v43, -inf }
 0x41c   : > { %1473 = vmax.xlane.f32.xlu0 %v1472_v45  ;;  %v2487_v46 = vpop.f32.mrf.mxu1 }
 0x41e   : > { %v1453_v47 = vpop.f32.mrf.mxu1 }
 0x41f   : > { %v1462_v50 = vmul.f32 0.25, %v1453_v47 }
 0x420   : > { %v2498_v51 = vpop.f32.mrf.mxu1 }
 0x421   : > { %v1467_v52 = vadd.f32 %v1463_v24, %v1462_v50 }
 0x422   : > { %v1456_v53 = vpop.f32.mrf.mxu1 }
 0x423   : > { %v1478_v55 = vsel %vm1468_vm6, %v1467_v52, -inf }
 0x424   : > { %1479 = vmax.xlane.f32.xlu0 %v1478_v55  ;;  %v2499_v57 = vpop.f32.mrf.mxu1 }
 0x429   : > { %1125 = vrot.lane.b32.xlu1 %v818_v58, %s2716_s0  ;;  %s3231_s0 = scalar_lea.vmem %s3192_s9, %s2835_s20 }
 0x49d   : > { %v1471_v59 = vpop.xlane.xlu1 %1470 }
 0x49e   : > { %v1481_v60 = vsub.f32 %v1464_v30, %v1471_v59 }
 0x4a0   : > { %v1485_v62 = vmul.f32 1.442695, %v1481_v60 }
 0x4a1   : > { %v1477_v4 = vpop.xlane.xlu1 %1476 }
 0x4a2   : > { %2652 = vpow2.f32 %v1485_v62  ;;  %v1483_v5 = vsub.f32 %v1466_v34, %v1477_v4 }
 0x4a4   : > { %v1489_v6 = vmul.f32 1.442695, %v1483_v5 }
 0x4a5   : > { %v1474_v63 = vpop.xlane.xlu0 %1473  ;;  %v1126_v14 = vpop.permute.xlu1 %1125 }
 0x4a6   : > { %v1482_v33 = vsub.f32 %v1465_v43, %v1474_v63 }
 0x4a8   : > { %v1487_v0 = vmul.f32 1.442695, %v1482_v33 }
 0x4aa   : > { %2654 = vpow2.f32 %v1487_v0 }
 0x4ab   : > { %2656 = vpow2.f32 %v1489_v6 }
 0x4ad   : > { %v1480_v7 = vpop.xlane.xlu0 %1479 }
 0x4ae   : > { %v1484_v8 = vsub.f32 %v1467_v52, %v1480_v7 }
 0x4af   : > { %v3024_v2 = vpop.eup %2652 }
 0x4b0   : > { %v1493_v35 = vsel %vm1468_vm6, %v3024_v2, 0.0  ;;  %v1491_v9 = vmul.f32 1.442695, %v1484_v8 }
 0x4b1   : > { %1494 = vadd.xlane.f32.xlu1 %v1493_v35 }
 0x4b2   : > { %2658 = vpow2.f32 %v1491_v9 }
 0x4b7   : > { %v3028_v3 = vpop.eup %2654 }
 0x4b8   : > { %v1496_v39 = vsel %vm1468_vm6, %v3028_v3, 0.0  ;;  %v3034_v10 = vpop.eup %2656 }
 0x4b9   : > { %1497 = vadd.xlane.f32.xlu0 %v1496_v39  ;;  %v1499_v11 = vsel %vm1468_vm6, %v3034_v10, 0.0 }
 0x4bf   : > { %v3038_v12 = vpop.eup %2658 }
 0x4c0   : > { %v1502_v13 = vsel %vm1468_vm6, %v3038_v12, 0.0 }
 0x4c2   : > { %1131 = vrot.lane.b32.xlu1 %v818_v58, %s2715_s30 }
 0x4cf   : > { %1128 = vrot.lane.b32.xlu0 %v818_v58, %s2717_s25 }
 0x4e6   : > { %1500 = vadd.xlane.f32.xlu1 %v1499_v11 }
 0x4ee   : > { %1503 = vadd.xlane.f32.xlu0 %v1502_v13 }
 0x53a   : > { %v1495_v15 = vpop.xlane.xlu1 %1494 }
 0x53b   : > { %2660 = vrcp.f32 %v1495_v15 }
 0x53e   : > { %v1132_v16 = vpop.permute.xlu1 %1131 }
 0x53f   : > { %v1150_v18 = vcombine.low %v1126_v14, %v1132_v16  ;;  %v1151_v19 = vcombine.high %v1126_v14, %v1132_v16 }
 0x541   : > { %v1158_v23 = vrot.slane %v1150_v18, %v2942_v49  ;;  %v1165_v24 = vrot.slane %v1151_v19, %v2942_v49  ;;  %v2632_v19 = vld [vmem:[%s3228_s3 + $0x18] sm:$0xff]  }
 0x542   : > { %v1498_v17 = vpop.xlane.xlu0 %1497 }
 0x543   : > { %2662 = vrcp.f32 %v1498_v17 }
 0x546   : > { %v1129_v20 = vpop.permute.xlu0 %1128 }
 0x547   : > { %v1134_v21 = vcombine.low %v818_v58, %v1129_v20  ;;  %v1135_v22 = vcombine.high %v818_v58, %v1129_v20  ;;  %v2633_v20 = vld [vmem:[%s3228_s3 + $0x10] sm:$0xff]  }
 0x548   : > { %v2661_v51 = vpop.eup %2660 }
 0x549   : > { %v1142_v25 = vrot.slane %v1134_v21, %v2942_v49  ;;  %v1149_v27 = vrot.slane %v1135_v22, %v2942_v49  ;;  %v1509_v0 = vmul.f32 %v2661_v51, %v3024_v2 }
 0x54b   : > { %v1166_v28 = vcombine.low %v1142_v25, %v1158_v23  ;;  %v1167_v29 = vcombine.high %v1142_v25, %v1158_v23  ;;  %v1182_v30 = vcombine.low %v1149_v27, %v1165_v24  ;;  %v1183_v31 = vcombine.high %v1149_v27, %v1165_v24 }
 0x54c   : > { %v1513_v7 = vpack.c.bf16 %v1509_v0, %v1509_v0 }
 0x54d   : > { %v1174_v32 = vrot.slane %v1166_v28, %v2945_v56  ;;  %v1181_v26 = vrot.slane %v1167_v29, %v2945_v56  ;;  %v1190_v34 = vrot.slane %v1182_v30, %v2945_v56  ;;  %v1197_v36 = vrot.slane %v1183_v31, %v2945_v56 }
 0x54f   : > { %v1202_v37 = vcombine.low %v1174_v32, %v1181_v26  ;;  %v2400_v38 = vcombine.high %v1174_v32, %v1181_v26  ;;  %v1218_v40 = vcombine.low %v1190_v34, %v1197_v36  ;;  %v2401_v41 = vcombine.high %v1190_v34, %v1197_v36 }
 0x550   : > { %v2663_v57 = vpop.eup %2662 }
 0x551   : > { %v1209_v42 = vrot.slane %v1202_v37, %v2942_v49  ;;  %v1217_v43 = vrot.slane %v2400_v38, %v2942_v49  ;;  %v1225_v44 = vrot.slane %v1218_v40, %v2942_v49  ;;  %v1233_v45 = vrot.slane %v2401_v41, %v2942_v49 }
 0x552   : > { %v1510_v35 = vmul.f32 %v2663_v57, %v3028_v3 }
 0x553   : > { %v1234_v46 = vcombine.low %v1209_v42, %v1217_v43  ;;  %v1250_v47 = vcombine.low %v1225_v44, %v1233_v45  ;;  %v1235_v48 = vcombine.high %v1209_v42, %v1217_v43  ;;  %v1251_v50 = vcombine.high %v1225_v44, %v1233_v45 }
 0x554   : > { %v1514_v8 = vpack.c.bf16 %v1510_v35, %v1510_v35 }
 0x555   : > { %v1242_v52 = vrot.slane %v1234_v46, %v2945_v56  ;;  %v1258_v53 = vrot.slane %v1250_v47, %v2945_v56  ;;  %v1249_v54 = vrot.slane %v1235_v48, %v2945_v56  ;;  %v1265_v55 = vrot.slane %v1251_v50, %v2945_v56  ;;  %v2634_v50 = vld [vmem:[%s3228_s3 + $0x8] sm:$0xff]  }
 0x557   : > { %v1266_v58 = vcombine.low %v1242_v52, %v1258_v53  ;;  %v1267_v59 = vcombine.high %v1242_v52, %v1258_v53  ;;  %v1268_v60 = vcombine.low %v1249_v54, %v1265_v55  ;;  %v1269_v62 = vcombine.high %v1249_v54, %v1265_v55 }
 0x559   : > { %v1270_v63 = vpack.c.bf16 %v1266_v58, %v1266_v58  ;;  %v1271_v33 = vpack.c.bf16 %v1267_v59, %v1267_v59  ;;  %v1272_v5 = vpack.c.bf16 %v1268_v60, %v1268_v60  ;;  %v1273_v6 = vpack.c.bf16 %v1269_v62, %v1269_v62  ;;  %v2635_v62 = vld [vmem:[%s3228_s3] sm:$0xff]  }
 0x55b   : > { %v1522_v39 = vsel %vm1520_vm7, %v1270_v63, 0  ;;  %v1568_v4 = vsel %vm1520_vm7, %v1271_v33, 0  ;;  %v1614_v2 = vsel %vm1520_vm7, %v1272_v5, 0  ;;  %v1660_v3 = vsel %vm1520_vm7, %v1273_v6, 0 }
 0x55c   : > { %2501 = vmatpush3.bf16.msra.mxu0 %v1522_v39  ;;  %2507 = vmatpush3.bf16.msra.mxu1 %v1568_v4 }
 0x55d   : > { %2512 = vmatprep.subr.bf16.mxu0 %v2721_v61  ;;  %2518 = vmatprep.subr.bf16.mxu1 %v2721_v61 }
 0x55f   : > { %2503 = vmatmul.mubr.msk.bf16.vlgmr.msra.gmra.mxu0 %vm1468_vm6, %v1513_v7  ;;  %2509 = vmatmul.mubr.msk.bf16.vlgmr.msra.gmra.mxu1 %vm1468_vm6, %v1514_v8 }
 0x560   : > { %2513 = vmatpush3.bf16.msra.mxu0 %v1614_v2  ;;  %2519 = vmatpush3.bf16.msra.mxu1 %v1660_v3 }
 0x561   : > { %2514 = vmatprep.mubr.msk.bf16.mxu0 %vm2722_vm4, %v2721_v61  ;;  %2520 = vmatprep.mubr.msk.bf16.mxu1 %vm2722_vm4, %v2721_v61 }
 0x562   : > { %2524 = vmatprep.subr.bf16.mxu0 %v2721_v61  ;;  %2536 = vmatprep.subr.bf16.mxu1 %v2721_v61 }
 0x56f   : > { %v1501_v9 = vpop.xlane.xlu1 %1500 }
 0x570   : > { %2664 = vrcp.f32 %v1501_v9 }
 0x577   : > { %v1504_v11 = vpop.xlane.xlu0 %1503 }
 0x578   : > { %2666 = vrcp.f32 %v1504_v11 }
 0x57d   : > { %v2665_v13 = vpop.eup %2664 }
 0x57e   : > { %v1511_v14 = vmul.f32 %v2665_v13, %v3034_v10 }
 0x580   : > { %v1515_v15 = vpack.c.bf16 %v1511_v14, %v1511_v14 }
 0x582   : > { %2515 = vmatmul.mubr.msk.bf16.vlgmr.msra.gmra.mxu0 %vm1468_vm6, %v1515_v15 }
 0x583   : > { %2532 = vmatprep.mubr.msk.bf16.mxu0 %vm2722_vm4, %v2721_v61  ;;  %2525 = vmatpush3.bf16.msra.mxu0 %v2632_v19 }
 0x584   : > { %2526 = vmatprep.subr.bf16.mxu0 %v2721_v61 }
 0x585   : > { %v2667_v16 = vpop.eup %2666 }
 0x586   : > { %v1512_v17 = vmul.f32 %v2667_v16, %v3038_v12 }
 0x587   : > { %2527 = vmatpush3.bf16.msra.mxu0 %v2633_v20  ;;  %v2412_v20 = vld [vmem:[%s3229_s24] ss:$0 sm:$0xff] }
 0x588   : > { %v1516_v18 = vpack.c.bf16 %v1512_v17, %v1512_v17  ;;  %2528 = vmatprep.subr.bf16.mxu0 %v2721_v61 }
 0x58a   : > { %2521 = vmatmul.mubr.msk.bf16.vlgmr.msra.gmra.mxu1 %vm1468_vm6, %v1516_v18 }
 0x58b   : > { %2544 = vmatprep.mubr.msk.bf16.mxu1 %vm2722_vm4, %v2721_v61  ;;  %2529 = vmatpush3.bf16.msra.mxu0 %v2634_v50 }
 0x58c   : > { %2530 = vmatprep.subr.bf16.mxu0 %v2721_v61 }
 0x58f   : > { %2531 = vmatpush3.bf16.msra.mxu0 %v2635_v62  ;;  %v2647_v62 = vld [vmem:[%s2890_s28] sm:$0xff]  }
 0x590   : > { %2548 = vmatprep.subr.bf16.mxu0 %v2721_v61 }
 0x61f   : > { %v1558_v10 = vpop.f32.mrf.mxu0  ;;  %v1604_v21 = vpop.f32.mrf.mxu1 }
 0x621   : > { %v2504_v22 = vpop.f32.mrf.mxu0  ;;  %v2510_v23 = vpop.f32.mrf.mxu1 }
 0x623   : > { %v1561_v24 = vpop.f32.mrf.mxu0  ;;  %v1607_v12 = vpop.f32.mrf.mxu1 }
 0x625   : > { %v2505_v25 = vpop.f32.mrf.mxu0  ;;  %v2511_v27 = vpop.f32.mrf.mxu1 }
 0x642   : > { %v1650_v28 = vpop.f32.mrf.mxu0 }
 0x643   : > { %v1702_v32 = vcombine.low %v1558_v10, %v1650_v28  ;;  %v1703_v26 = vcombine.high %v1558_v10, %v1650_v28 }
 0x644   : > { %v2516_v29 = vpop.f32.mrf.mxu0 }
 0x645   : > { %v1710_v40 = vrot.slane %v1702_v32, %v2942_v49  ;;  %v1717_v41 = vrot.slane %v1703_v26, %v2942_v49  ;;  %v2636_v32 = vld [vmem:[%s2881_s5 + $0x18] sm:$0xff]   ;;  %v2638_v26 = vld [vmem:[%s2881_s5 + $0x8] sm:$0xff]  }
 0x646   : > { %v1653_v30 = vpop.f32.mrf.mxu0  ;;  %2537 = vmatpush3.bf16.msra.mxu1 %v2636_v32 }
 0x647   : > { %2538 = vmatprep.subr.bf16.mxu1 %v2721_v61 }
 0x648   : > { %v2517_v31 = vpop.f32.mrf.mxu0 }
 0x64a   : > { %v1696_v34 = vpop.f32.mrf.mxu1 }
 0x64b   : > { %v1718_v36 = vcombine.low %v1604_v21, %v1696_v34  ;;  %v1719_v37 = vcombine.high %v1604_v21, %v1696_v34  ;;  %v2639_v34 = vld [vmem:[%s2881_s5] sm:$0xff]  }
 0x64c   : > { %v2522_v38 = vpop.f32.mrf.mxu1 }
 0x64d   : > { %v1726_v42 = vrot.slane %v1718_v36, %v2942_v49  ;;  %v1733_v43 = vrot.slane %v1719_v37, %v2942_v49 }
 0x64e   : > { %v1699_v44 = vpop.f32.mrf.mxu1 }
 0x64f   : > { %v1734_v45 = vcombine.low %v1710_v40, %v1726_v42  ;;  %v1735_v46 = vcombine.high %v1710_v40, %v1726_v42  ;;  %v1750_v47 = vcombine.low %v1717_v41, %v1733_v43  ;;  %v1751_v48 = vcombine.high %v1717_v41, %v1733_v43 }
 0x650   : > { %v2523_v51 = vpop.f32.mrf.mxu1 }
 0x651   : > { %v1742_v52 = vrot.slane %v1734_v45, %v2945_v56  ;;  %v1749_v53 = vrot.slane %v1735_v46, %v2945_v56  ;;  %v1758_v54 = vrot.slane %v1750_v47, %v2945_v56  ;;  %v1765_v55 = vrot.slane %v1751_v48, %v2945_v56  ;;  %v2418_v46 = vld [vmem:[%s3230_s14] ss:$0 sm:$0xff] }
 0x652   : > { %v2419_v48 = vld [vmem:[%s3231_s0] ss:$0 sm:$0xff] }
 0x653   : > { %v1770_v57 = vcombine.low %v1742_v52, %v1749_v53  ;;  %v2410_v58 = vcombine.high %v1742_v52, %v1749_v53  ;;  %v1786_v59 = vcombine.low %v1758_v54, %v1765_v55  ;;  %v2411_v60 = vcombine.high %v1758_v54, %v1765_v55  ;;  %v2640_v53 = vld [vmem:[%s2890_s28 + $0x38] sm:$0xff]   ;;  %v2641_v54 = vld [vmem:[%s2890_s28 + $0x30] sm:$0xff]   ;;  %v2642_v55 = vld [vmem:[%s2890_s28 + $0x28] sm:$0xff]  }
 0x655   : > { %v1777_v63 = vrot.slane %v1770_v57, %v2942_v49  ;;  %v1785_v33 = vrot.slane %v2410_v58, %v2942_v49  ;;  %v1793_v0 = vrot.slane %v1786_v59, %v2942_v49  ;;  %v1801_v35 = vrot.slane %v2411_v60, %v2942_v49  ;;  %v2643_v57 = vld [vmem:[%s2890_s28 + $0x20] sm:$0xff]   ;;  %v2644_v58 = vld [vmem:[%s2890_s28 + $0x18] sm:$0xff]   ;;  %v2645_v59 = vld [vmem:[%s2890_s28 + $0x10] sm:$0xff]  }
 0x656   : > { %v2646_v60 = vld [vmem:[%s2890_s28 + $0x8] sm:$0xff]  }
 0x657   : > { %v1803_v39 = vcombine.high %v1777_v63, %v1785_v33  ;;  %v1819_v4 = vcombine.high %v1793_v0, %v1801_v35  ;;  %v1802_v5 = vcombine.low %v1777_v63, %v1785_v33  ;;  %v1818_v6 = vcombine.low %v1793_v0, %v1801_v35  ;;  %v2420_v63 = vld [vmem:[%s657_s6] ss:$0 sm:$0xff] }
 0x659   : > { %v1817_v7 = vrot.slane %v1803_v39, %v2945_v56  ;;  %v1833_v8 = vrot.slane %v1819_v4, %v2945_v56  ;;  %v1810_v2 = vrot.slane %v1802_v5, %v2945_v56  ;;  %v1826_v3 = vrot.slane %v1818_v6, %v2945_v56 }
 0x65b   : > { %v1836_v9 = vcombine.low %v1817_v7, %v1833_v8  ;;  %v1835_v11 = vcombine.high %v1810_v2, %v1826_v3  ;;  %v1834_v13 = vcombine.low %v1810_v2, %v1826_v3  ;;  %v1837_v49 = vcombine.high %v1817_v7, %v1833_v8 }
 0x65d   : > { %1843 = vrot.lane.b32.xlu1 %v1836_v9, %s2723_s4  ;;  %1839 = vrot.lane.b32.xlu0 %v1835_v11, %s2724_s23 }
 0x661   : > { %1847 = vrot.lane.b32.xlu1 %v1837_v49, %s2725_s16  ;;  %v2426_v49 = vld [vmem:[%s665_s17] ss:$0 sm:$0xff] }
 0x6cf   : > { %v1844_v14 = vpop.permute.xlu1 %1843  ;;  %v1840_v15 = vpop.permute.xlu0 %1839 }
 0x6d0   : > { %v1850_v16 = vsel %vm1274_vm5, %v1834_v13, %v1840_v15 }
 0x6d1   : > { %v1852_v18 = vsel %vm1851_vm8, %v1850_v16, %v1844_v14 }
 0x6d3   : > { %v1848_v17 = vpop.permute.xlu1 %1847 }
 0x6d4   : > { %v1854_v56 = vsel %vm1853_vm9, %v1852_v18, %v1848_v17 }
 0x6d5   : > { %v1855_v19 = vpack.c.bf16 %v1854_v56, %v1854_v56 }
 0x6d7   : > { %2533 = vmatmul.mubr.msk.bf16.vlgmr.msra.gmra.mxu0 %vm681_vm1, %v1855_v19 }
 0x6d8   : > { %2564 = vmatprep.mubr.msk.bf16.mxu0 %vm2722_vm4, %v2721_v61  ;;  %2549 = vmatpush3.bf16.msra.mxu0 %v2640_v53 }
 0x6d9   : > { %2550 = vmatprep.subr.bf16.mxu0 %v2721_v61 }
 0x6dc   : > { %2551 = vmatpush3.bf16.msra.mxu0 %v2641_v54 }
 0x6dd   : > { %2552 = vmatprep.subr.bf16.mxu0 %v2721_v61 }
 0x6e0   : > { %2553 = vmatpush3.bf16.msra.mxu0 %v2642_v55 }
 0x6e1   : > { %2554 = vmatprep.subr.bf16.mxu0 %v2721_v61 }
 0x6e4   : > { %2555 = vmatpush3.bf16.msra.mxu0 %v2643_v57 }
 0x6e5   : > { %2556 = vmatprep.subr.bf16.mxu0 %v2721_v61 }
 0x6e8   : > { %2557 = vmatpush3.bf16.msra.mxu0 %v2644_v58 }
 0x6e9   : > { %2558 = vmatprep.subr.bf16.mxu0 %v2721_v61 }
 0x6ec   : > { %2559 = vmatpush3.bf16.msra.mxu0 %v2645_v59 }
 0x6ed   : > { %2560 = vmatprep.subr.bf16.mxu0 %v2721_v61 }
 0x6f0   : > { %2561 = vmatpush3.bf16.msra.mxu0 %v2646_v60 }
 0x6f1   : > { %2562 = vmatprep.subr.bf16.mxu0 %v2721_v61 }
 0x6f4   : > { %2563 = vmatpush3.bf16.msra.mxu0 %v2647_v62 }
 0x797   : > { %v1932_v10 = vpop.f32.mrf.mxu0 }
 0x798   : > { %v1933_v21 = vadd.f32 %v2412_v20, %v1932_v10 }
 0x799   : > { %v2534_v22 = vpop.f32.mrf.mxu0 }
 0x79a   : > { %v3116_v23 = vadd.f32 %v1933_v21, %v2904_v1  ;;  %v2637_v1 = vld [vmem:[%s2881_s5 + $0x10] sm:$0xff]  }
 0x79b   : > { %v1935_v24 = vpop.f32.mrf.mxu0  ;;  %2539 = vmatpush3.bf16.msra.mxu1 %v2637_v1 }
 0x79c   : > { %v1941_v12 = vsel %vm681_vm1, %v3116_v23, 0.0  ;;  %2540 = vmatprep.subr.bf16.mxu1 %v2721_v61 }
 0x79d   : > { %1942 = vadd.xlane.f32.xlu0 %v1941_v12  ;;  %v2535_v25 = vpop.f32.mrf.mxu0 }
 0x79f   : > { %2541 = vmatpush3.bf16.msra.mxu1 %v2638_v26 }
 0x7a0   : > { %2542 = vmatprep.subr.bf16.mxu1 %v2721_v61 }
 0x7a3   : > { %2543 = vmatpush3.bf16.msra.mxu1 %v2639_v34 }
 0x826   : > { %v1943_v27 = vpop.xlane.xlu0 %1942 }
 0x827   : > { %v1944_v28 = vmul.f32 0.015625, %v1943_v27 }
 0x829   : > { %v1945_v29 = vsub.f32 %v3116_v23, %v1944_v28 }
 0x82b   : > { %v1946_v30 = vmul.f32 %v1945_v29, %v1945_v29 }
 0x82d   : > { %v1947_v31 = vsel %vm681_vm1, %v1946_v30, 0.0 }
 0x82e   : > { %1948 = vadd.xlane.f32.xlu1 %v1947_v31 }
 0x8b7   : > { %v1949_v36 = vpop.xlane.xlu1 %1948 }
 0x8b8   : > { %v1950_v37 = vmul.f32 0.015625, %v1949_v36 }
 0x8ba   : > { %2668 = vrsqrt.f32 %v1950_v37  ;;  %vm1953_vm10 = vcmp.eq.f32.partialorder %v1950_v37, inf  ;;  %v1956_v41 = vand.u32 2147483648, %v1950_v37  ;;  %vm1955_vm11 = vcmp.eq.f32.partialorder %v1950_v37, 0.0 }
 0x8c7   : > { %v2669_v38 = vpop.eup %2668 }
 0x8c8   : > { %v1952_v40 = vmul.f32 %v2669_v38, %v1950_v37 }
 0x8ca   : > { %v1954_v42 = vsel %vm1953_vm10, %v1950_v37, %v1952_v40 }
 0x8cb   : > { %v1957_v43 = vsel %vm1955_vm11, %v1956_v41, %v1954_v42 }
 0x8cc   : > { %v1958_v44 = vadd.f32 1e-05, %v1957_v43 }
 0x8ce   : > { %2670 = vrcp.f32 %v1958_v44 }
 0x8db   : > { %v2671_v45 = vpop.eup %2670 }
 0x8dc   : > { %v1960_v47 = vmul.f32 %v2671_v45, %v1945_v29 }
 0x8de   : > { %v1967_v50 = vmul.f32 %v2418_v46, %v1960_v47 }
 0x8e0   : > { %v1974_v51 = vadd.f32 %v2419_v48, %v1967_v50 }
 0x8e2   : > { %v1975_v52 = vpack.c.bf16 %v1974_v51, %v1974_v51 }
 0x8e4   : > { %2545 = vmatmul.mubr.msk.bf16.vlgmr.msra.gmra.mxu1 %vm681_vm1, %v1975_v52 }
 0x9a4   : > { %v2052_v33 = vpop.f32.mrf.mxu1 }
 0x9a5   : > { %v2053_v0 = vadd.f32 %v2420_v63, %v2052_v33 }
 0x9a6   : > { %v2546_v35 = vpop.f32.mrf.mxu1 }
 0x9a7   : > { %v2059_v39 = vmul.f32 %v2053_v0, %v2053_v0  ;;  %v2058_v3 = vmul.f32 0.5, %v2053_v0 }
 0x9a8   : > { %v2055_v4 = vpop.f32.mrf.mxu1 }
 0x9a9   : > { %v2060_v5 = vmul.f32 %v2059_v39, %v2053_v0 }
 0x9aa   : > { %v2547_v6 = vpop.f32.mrf.mxu1 }
 0x9ab   : > { %v2061_v7 = vmul.f32 0.044715, %v2060_v5 }
 0x9ad   : > { %v2062_v8 = vadd.f32 %v2061_v7, %v2053_v0 }
 0x9af   : > { %v2063_v2 = vmul.f32 0.7978845, %v2062_v8 }
 0x9b1   : > { %2672 = vtanh.f32 %v2063_v2 }
 0x9be   : > { %v2673_v61 = vpop.eup %2672 }
 0x9bf   : > { %v2065_v9 = vadd.f32 1.0, %v2673_v61 }
 0x9c1   : > { %v2066_v11 = vmul.f32 %v2065_v9, %v2058_v3 }
 0x9c3   : > { %v2067_v13 = vpack.c.bf16 %v2066_v11, %v2066_v11 }
 0x9c5   : > { %2565 = vmatmul.mubr.bf16.vlgmr.msra.gmra.mxu0 %v2067_v13 }
 0xa85   : > { %v2173_v14 = vpop.f32.mrf.mxu0 }
 0xa86   : > { %v2174_v15 = vadd.f32 %v2426_v49, %v2173_v14 }
 0xa87   : > { %v2566_v16 = vpop.f32.mrf.mxu0 }
 0xa88   : > { %v2179_v17 = vadd.f32 %v2174_v15, %v3116_v23 }
 0xa89   : > { %v2176_v18 = vpop.f32.mrf.mxu0 }
 0xa8a   : > { %2180 = vst.msk [vmem:[%s2899_s18] sm:$0xff] %vm681_vm1, %v2179_v17 }
 0xa8b   : > { %v2567_v56 = vpop.f32.mrf.mxu0 }
 0xa8c PF: > { %s3232_s22 = sld [smem:[#allocation5_spill]] }
 0xa8d   : > { %s3233_s29 = sld [smem:[#allocation3_spill]] }
 0xa8e   : > { %s3234_s30 = sld [smem:[#allocation4_spill]] }
 0xa8f   : > { %s3235_s15 = sld [smem:[#allocation6_spill]] }
 0xa90   : > { %s3236_s16 = sld [smem:[#allocation7_spill]] }
 0xa92   : > { %s24_s17 = sadd.s32 1, %s3232_s22  }
 0xa93   : > { %p21_p8 = scmp.ge.s32.totalorder %s24_s17, 6  }
 0xa95   :  { %23 = sbr.rel (!%p21_p8) target bundleno = 8 (0x8), region = 146 }

</bundles_post_ra>
